<compile_context>
chip_gen: v6e
topology: v6e:2x2x1
jax: 0.10.0
libtpu: 0.0.40
codegen_flags: <defaults>
</compile_context>

<pallas_src>
import functools

import jax
import jax.numpy as jnp
from jax.experimental import pallas as pl
from jax.experimental.pallas import tpu as pltpu

VAE_SCALING = 0.18215
IMAGENET_MEAN = jnp.array([0.485, 0.456, 0.406], dtype=jnp.float32)
IMAGENET_STD = jnp.array([0.229, 0.224, 0.225], dtype=jnp.float32)


def _round_up(x, m):
    return (x + m - 1) // m * m


def _pick_vmem_limit():
    """Per-generation scoped-VMEM limit: ~half of physical, safe fallback."""
    try:
        cap = int(pltpu.get_tpu_info().vmem_capacity_bytes)
        return int(min(max(cap // 2, 32 * 1024 * 1024), 100 * 1024 * 1024))
    except Exception:
        return 32 * 1024 * 1024


_VMEM_LIMIT = _pick_vmem_limit()


# -----------------------------------------------------------------------------
# Kernel 1: tiled, K-accumulating (A @ B + bias) * scale matmul
#   - operands may be bf16 in HBM; upcast to f32 in-kernel (no bf16 dot)
#   - f32 VMEM accumulator, f32 epilogue
#   - output tiled along its last (lane) axis -> lane-dense stores
#   - grid = (N/tn, K/tk): N parallel, K reduction last
# -----------------------------------------------------------------------------
def _matmul_bias_kernel(x_ref, w_ref, b_ref, o_ref, acc_ref, *, scale):
    @pl.when(pl.program_id(1) == 0)
    def _():
        acc_ref[...] = jnp.zeros_like(acc_ref)

    acc_ref[...] += jnp.dot(x_ref[...].astype(jnp.float32),
                            w_ref[...].astype(jnp.float32),
                            preferred_element_type=jnp.float32)

    @pl.when(pl.program_id(1) == pl.num_programs(1) - 1)
    def _():
        o_ref[...] = ((acc_ref[...] + b_ref[...].astype(jnp.float32)) * scale
                      ).astype(o_ref.dtype)


def matmul_bias(x, w, b2d, scale=1.0, *, k_cap=4096, n_cap=2048):
    """(x @ w + b2d) * scale -> (M, N) f32.

    x:(M,K), w:(K,N), b2d:(1,N) or (M,1).  M is assumed small (batch /
    latent-channel axis); N is the lane-dense output axis.  K and N are padded
    so the chosen tiles always divide (no full-dim VMEM-blowing fallback).
    """
    M, K = x.shape
    N = w.shape[1]
    row_bias = b2d.shape[0] != 1                 # (M, 1) bias over output rows

    tk = _round_up(K, 8) if K <= k_cap else k_cap       # whole-K when small
    tn = min(_round_up(N, 128), n_cap)
    Kp = _round_up(K, tk)
    Np = _round_up(N, tn)
    if Kp != K:                                   # zero-pad contraction (exact)
        x = jnp.pad(x, ((0, 0), (0, Kp - K)))
        w = jnp.pad(w, ((0, Kp - K), (0, 0)))
    if Np != N:
        w = jnp.pad(w, ((0, 0), (0, Np - N)))
        if not row_bias:
            b2d = jnp.pad(b2d, ((0, 0), (0, Np - N)))

    if row_bias:
        b_spec = pl.BlockSpec((M, 1), lambda j, k: (0, 0))
    else:
        b_spec = pl.BlockSpec((1, tn), lambda j, k: (0, j))

    out = pl.pallas_call(
        functools.partial(_matmul_bias_kernel, scale=scale),
        grid=(Np // tn, Kp // tk),
        in_specs=[
            pl.BlockSpec((M, tk), lambda j, k: (0, k)),
            pl.BlockSpec((tk, tn), lambda j, k: (k, j)),
            b_spec,
        ],
        out_specs=pl.BlockSpec((M, tn), lambda j, k: (0, j)),
        out_shape=jax.ShapeDtypeStruct((M, Np), jnp.float32),
        scratch_shapes=[pltpu.VMEM((M, tn), jnp.float32)],
        compiler_params=pltpu.CompilerParams(
            dimension_semantics=("parallel", "arbitrary"),
            vmem_limit_bytes=_VMEM_LIMIT),
    )(x, w, b2d.astype(jnp.float32))
    return out[:, :N] if Np != N else out


# -----------------------------------------------------------------------------
# Kernel 2: fused EDM preconditioning + UNet stub + weighted-MSE
#   grid = (B, V); latents carried as (B, V, C, hw); view-0 conditioning
#   latents come from a second BlockSpec on the SAME latents array.
# -----------------------------------------------------------------------------
def _diffusion_loss_kernel(coef_ref, lat_ref, cond_ref, noise_ref, bias_ref,
                           wu_ref, pred_ref, loss_ref, *, n_latent_c):
    b = pl.program_id(0)
    sigma = coef_ref[b, 0]
    c_in = coef_ref[b, 1]
    c_out = coef_ref[b, 2]
    c_skip = coef_ref[b, 3]
    c_noise = coef_ref[b, 4]
    loss_w = coef_ref[b, 5]

    lat = lat_ref[0, 0]                                   # (C, hw) f32
    noisy = lat + sigma * noise_ref[0, 0]                 # latents + sigma*noise
    cond = cond_ref[0, 0] * (1.0 / VAE_SCALING)           # view-0 latents / scaling

    # Fused UNet-stub 1x1 "conv" over cat([c_in*noisy, cond_latents], channel)
    # expressed as two small dots (no (2C, hw) staging scratch), plus the
    # per-(batch, view) conditioning bias (time ids + image embedding, hoisted
    # to the wrapper) and c_noise.
    # TODO(synk): the real UNetSpatioTemporalConditionModel is not expressible
    # here; c_noise is applied as an additive scalar instead of conditioning a
    # timestep embedding (functional-form difference of the stub only).
    c = n_latent_c
    w_a = wu_ref[:, 0:c]                                  # (C, C)
    w_b = wu_ref[:, c:2 * c]                              # (C, C)
    mo = (jnp.dot(w_a, c_in * noisy, preferred_element_type=jnp.float32)
          + jnp.dot(w_b, cond, preferred_element_type=jnp.float32))
    mo = mo + bias_ref[0, 0] + c_noise                    # (C,1) bias broadcasts

    pred = c_out * mo + c_skip * noisy                    # pred_original_latents
    pred_ref[0, 0] = pred

    diff = pred - lat                                     # gt_latents == latents here
    loss_ref[...] = jnp.broadcast_to(loss_w * jnp.sum(diff * diff), loss_ref.shape)


def diffusion_loss(coeffs, latents, noises, bias_bvc, w_unet_t):
    """coeffs:(B,6) f32; latents/noises:(B,V,C,hw) f32; bias_bvc:(B,V,C,1) f32;
    w_unet_t:(C,2C) f32."""
    B, V, C, hw = latents.shape
    blk = pl.BlockSpec((1, 1, C, hw), lambda b, v: (b, v, 0, 0))
    blk_cond = pl.BlockSpec((1, 1, C, hw), lambda b, v: (b, 0, 0, 0))  # view 0
    pred, loss_parts = pl.pallas_call(
        functools.partial(_diffusion_loss_kernel, n_latent_c=C),
        grid=(B, V),
        in_specs=[
            pl.BlockSpec(memory_space=pltpu.MemorySpace.SMEM),   # EDM coeffs (B,6)
            blk,                                                 # latents tile
            blk_cond,                                            # view-0 latents
            blk,                                                 # noise tile
            pl.BlockSpec((1, 1, C, 1), lambda b, v: (b, v, 0, 0)),  # per-view bias
            pl.BlockSpec((C, 2 * C), lambda b, v: (0, 0)),       # fused UNet weight
        ],
        out_specs=[
            blk,                                                 # pred latents
            pl.BlockSpec((1, 1, 1, 1), lambda b, v: (b, v, 0, 0)),  # loss part
        ],
        out_shape=[
            jax.ShapeDtypeStruct((B, V, C, hw), jnp.float32),
            jax.ShapeDtypeStruct((B, V, 1, 1), jnp.float32),
        ],
        compiler_params=pltpu.CompilerParams(
            dimension_semantics=("parallel", "parallel"),  # B*V steps -> megacore
            vmem_limit_bytes=_VMEM_LIMIT),
    )(coeffs, latents, latents, noises, bias_bvc, w_unet_t)
    return pred, loss_parts


# -----------------------------------------------------------------------------
# Parameter init (deterministic synthetic stand-ins for the pretrained models)
# -----------------------------------------------------------------------------
def init_params(key, C=3, patch=8, latent_c=4, embed_dim=128, H=32, W=32):
    ks = jax.random.split(key, 5)
    K = C * patch * patch
    D = C * H * W
    return dict(
        w_vae=jax.random.normal(ks[0], (K, latent_c), jnp.float32) / jnp.sqrt(K),
        b_vae=jnp.zeros((latent_c,), jnp.float32),
        w_img=jax.random.normal(ks[1], (D, embed_dim), jnp.float32) / jnp.sqrt(D),
        b_img=jnp.zeros((embed_dim,), jnp.float32),
        w_unet=jax.random.normal(ks[2], (2 * latent_c, latent_c), jnp.float32) * 0.5,
        w_emb=jax.random.normal(ks[3], (embed_dim, latent_c), jnp.float32)
        / jnp.sqrt(embed_dim),
        w_time=jax.random.normal(ks[4], (3, latent_c), jnp.float32) * 0.5,
    )


def rand_log_normal(key, shape, loc=0.0, scale=1.0):
    """JAX port of the reference rand_log_normal."""
    u = jax.random.uniform(key, shape, dtype=jnp.float32) * (1.0 - 2e-07) + 1e-07
    return jnp.exp(loc + scale * jax.scipy.special.ndtri(u))


# -----------------------------------------------------------------------------
# SV3D.compute_loss forward (diffuse_and_denoise training step)
# -----------------------------------------------------------------------------
def sv3d_compute_loss(params, images, cam_poses, key, patch=8):
    # images: (B, V, C, H, W) in [0, 1]   (NCHW per view, as in PyTorch)
    # cam_poses: (B, V, 3)  (polar_rad, azimuth_rad, radius)
    B, V, C, H, W = images.shape
    h, w = H // patch, W // patch
    hw = h * w
    lc = params["w_vae"].shape[1]
    E = params["w_img"].shape[1]

    # ---- CLIP image-encoder stand-in (single lane-dense projection) ----------
    # TODO(synk): antialiased 224x224 CLIP-preprocessing resize is skipped; we
    # normalize at native resolution and use a single linear projection.
    cond_images = images[:, 0]                                          # (B,C,H,W)
    norm = (cond_images - IMAGENET_MEAN[None, :, None, None]) \
        / IMAGENET_STD[None, :, None, None]
    cond_image_embeds = matmul_bias(norm.reshape(B, C * H * W).astype(jnp.bfloat16),
                                    params["w_img"].astype(jnp.bfloat16),
                                    params["b_img"].reshape(1, E))      # (B,E) f32

    # ---- VAE encode stand-in (8x patchify conv as a matmul) ------------------
    # *2-1 and the bf16 cast are fused BEFORE the patchify transpose (half the
    # bytes shuffled); the matmul keeps the big patch axis lane-dense.
    # TODO(synk): full fusion (patchify inside the kernel via element-offset
    # index_map on images) is a further step not taken here.
    x = images.astype(jnp.bfloat16) * 2.0 - 1.0                         # bf16
    patches_t = x.reshape(B, V, C, h, patch, w, patch) \
        .transpose(2, 4, 6, 0, 1, 3, 5) \
        .reshape(C * patch * patch, B * V * hw)                         # (K, BVhw) bf16
    lat_t = matmul_bias(params["w_vae"].T.astype(jnp.bfloat16), patches_t,
                        params["b_vae"].reshape(lc, 1), scale=VAE_SCALING)
    latents = lat_t.reshape(lc, B, V, hw).transpose(1, 2, 0, 3)         # (B,V,lc,hw)

    # ---- camera poses -> added_time_ids; fold time-id + image-embedding
    # conditioning into one tiny per-(batch, view, channel) additive bias ------
    polars_rad = cam_poses[:, :, 0]
    azimuths_deg = jnp.rad2deg(cam_poses[:, :, 1])
    azimuths_deg = (azimuths_deg - azimuths_deg[:, 0:1]) % 360.0
    azimuths_rad = jnp.deg2rad(azimuths_deg)
    added_time_ids = jnp.stack(
        [1e-05 * jnp.ones_like(polars_rad), polars_rad, azimuths_rad], axis=-1)
    emb_proj = cond_image_embeds @ params["w_emb"]                      # (B,lc)
    time_emb = added_time_ids @ params["w_time"]                        # (B,V,lc)
    bias_bvc = (time_emb + emb_proj[:, None, :])[..., None]             # (B,V,lc,1)

    # ---- noises, sigmas, hoisted EDM scalar coefficients ---------------------
    # TODO(synk): noise could be drawn in-kernel (pltpu.prng_*) to save an HBM
    # round-trip, but that changes the RNG stream vs jax.random; kept host-side.
    k_noise, k_sigma = jax.random.split(key)
    noises = jax.random.normal(k_noise, latents.shape, dtype=jnp.float32)
    sigmas = rand_log_normal(k_sigma, (B,), loc=0.7, scale=1.6)
    s2 = sigmas * sigmas
    denom = jnp.sqrt(s2 + 1.0)
    coeffs = jnp.stack(
        [sigmas,                                   # sigma
         1.0 / denom,                              # c_in
         -sigmas / denom,                          # c_out
         1.0 / (s2 + 1.0),                         # c_skip
         jnp.log(sigmas) / 4.0,                    # c_noise
         (s2 + 1.0) / jnp.maximum(s2, 1e-08)],     # loss weight (clamped)
        axis=-1).astype(jnp.float32)               # (B, 6)

    # ---- fused EDM precondition + UNet stub + weighted MSE (Pallas) ----------
    w_unet_t = params["w_unet"].T.astype(jnp.float32)                   # (lc, 2*lc)
    pred, loss_parts = diffusion_loss(coeffs, latents, noises, bias_bvc, w_unet_t)
    loss = jnp.sum(loss_parts) / (B * V * lc * hw)                      # global mean
    pred_bvchw = pred.reshape(B, V, lc, h, w)                           # free reshape
    return loss, pred_bvchw


if __name__ == "__main__":
    B, V, C, H, W = 2, 8, 3, 32, 32
    key = jax.random.PRNGKey(0)
    k_param, k_img, k_fwd = jax.random.split(key, 3)

    params = init_params(k_param, C=C, patch=8, latent_c=4, embed_dim=128, H=H, W=W)
    images = jax.random.uniform(k_img, (B, V, C, H, W), dtype=jnp.float32)  # [0,1]
    polars = jnp.full((B, V), jnp.deg2rad(80.0), dtype=jnp.float32)
    azimuths = jnp.broadcast_to(
        jnp.deg2rad(jnp.linspace(0.0, 360.0, V + 1, dtype=jnp.float32)[1:] % 360.0),
        (B, V))
    cam_poses = jnp.stack([polars, azimuths, jnp.zeros((B, V), jnp.float32)], axis=-1)

    loss, pred = jax.jit(sv3d_compute_loss)(params, images, cam_poses, k_fwd)
    jax.block_until_ready((loss, pred))
    assert pred.shape == (B, V, 4, H // 8, W // 8)
    assert bool(jnp.isfinite(loss))
    print("KERNEL_OK")
</pallas_src>

<mosaic_0001>
module attributes {stable_mosaic.version = 11 : i64} {
  func.func @_matmul_bias_kernel(%arg0: i32, %arg1: i32, %arg2: memref<4x192xbf16, #tpu.memory_space<vmem>>, %arg3: memref<192x256xbf16, #tpu.memory_space<vmem>>, %arg4: memref<4x1xf32, #tpu.memory_space<vmem>>, %arg5: memref<4x256xf32, #tpu.memory_space<vmem>>, %arg6: memref<4x256xf32, #tpu.memory_space<vmem>>) attributes {dimension_semantics = [#tpu.dimension_semantics<parallel>, #tpu.dimension_semantics<arbitrary>], iteration_bounds = array<i64: 1, 1>, scalar_prefetch = 0 : i64, scratch_operands = 1 : i64, tpu.core_type = #tpu.core_type<tc>, window_params = [{transform_indices = @transform_0, window_bounds = array<i64: 4, 192>}, {transform_indices = @transform_1, window_bounds = array<i64: 192, 256>}, {pipeline_mode = #tpu.pipeline_mode<synchronous>, transform_indices = @transform_2, window_bounds = array<i64: 4, 1>}, {transform_indices = @transform_3, window_bounds = array<i64: 4, 256>}]} {
    %c0_i32 = arith.constant 0 : i32
    %0 = arith.cmpi eq, %arg1, %c0_i32 : i32
    %1 = arith.extui %0 : i1 to i32
    %c0_i32_0 = arith.constant 0 : i32
    %2 = arith.cmpi ne, %1, %c0_i32_0 : i32
    scf.if %2 {
      %cst_10 = arith.constant 0.000000e+00 : f32
      %14 = vector.broadcast %cst_10 : f32 to vector<4x256xf32>
      %c0_11 = arith.constant 0 : index
      %c0_12 = arith.constant 0 : index
      %15 = vector.load %arg6[%c0_11, %c0_12] : memref<4x256xf32, #tpu.memory_space<vmem>>, vector<4x256xf32>
      tpu.vector_store %arg6[%c0_11, %c0_12], %14 {strides = array<i32>} : memref<4x256xf32, #tpu.memory_space<vmem>>, vector<4x256xf32>,
    } else {
    }
    %c0 = arith.constant 0 : index
    %c0_1 = arith.constant 0 : index
    %3 = vector.load %arg6[%c0, %c0_1] : memref<4x256xf32, #tpu.memory_space<vmem>>, vector<4x256xf32>
    %c0_2 = arith.constant 0 : index
    %c0_3 = arith.constant 0 : index
    %4 = vector.load %arg2[%c0_2, %c0_3] : memref<4x192xbf16, #tpu.memory_space<vmem>>, vector<4x192xbf16>
    %5 = arith.extf %4 : vector<4x192xbf16> to vector<4x192xf32>
    %c0_4 = arith.constant 0 : index
    %c0_5 = arith.constant 0 : index
    %6 = vector.load %arg3[%c0_4, %c0_5] : memref<192x256xbf16, #tpu.memory_space<vmem>>, vector<192x256xbf16>
    %7 = arith.extf %6 : vector<192x256xbf16> to vector<192x256xf32>
    %cst = arith.constant dense<0.000000e+00> : vector<4x256xf32>
    %8 = tpu.matmul %5, %7, %cst {dimension_numbers = #tpu.dot_dimension_numbers<[1], [0], [0], [1], [0, 0, 1, 1], [], []>} : vector<4x192xf32>, vector<192x256xf32>, vector<4x256xf32> -> vector<4x256xf32>
    %9 = arith.addf %3, %8 : vector<4x256xf32>
    %c0_6 = arith.constant 0 : index
    %c0_7 = arith.constant 0 : index
    %10 = vector.load %arg6[%c0_6, %c0_7] : memref<4x256xf32, #tpu.memory_space<vmem>>, vector<4x256xf32>
    tpu.vector_store %arg6[%c0_6, %c0_7], %9 {strides = array<i32>} : memref<4x256xf32, #tpu.memory_space<vmem>>, vector<4x256xf32>,
    %c0_i32_8 = arith.constant 0 : i32
    %11 = arith.cmpi eq, %arg1, %c0_i32_8 : i32
    %12 = arith.extui %11 : i1 to i32
    %c0_i32_9 = arith.constant 0 : i32
    %13 = arith.cmpi ne, %12, %c0_i32_9 : i32
    scf.if %13 {
      %c0_10 = arith.constant 0 : index
      %c0_11 = arith.constant 0 : index
      %14 = vector.load %arg6[%c0_10, %c0_11] : memref<4x256xf32, #tpu.memory_space<vmem>>, vector<4x256xf32>
      %c0_12 = arith.constant 0 : index
      %c0_13 = arith.constant 0 : index
      %15 = vector.load %arg4[%c0_12, %c0_13] : memref<4x1xf32, #tpu.memory_space<vmem>>, vector<4x1xf32>
      %16 = vector.broadcast %15 : vector<4x1xf32> to vector<4x256xf32>
      %17 = arith.addf %14, %16 : vector<4x256xf32>
      %cst_14 = arith.constant 1.821500e-01 : f32
      %18 = vector.broadcast %cst_14 : f32 to vector<4x256xf32>
      %19 = arith.mulf %17, %18 : vector<4x256xf32>
      %c0_15 = arith.constant 0 : index
      %c0_16 = arith.constant 0 : index
      %20 = vector.load %arg5[%c0_15, %c0_16] : memref<4x256xf32, #tpu.memory_space<vmem>>, vector<4x256xf32>
      tpu.vector_store %arg5[%c0_15, %c0_16], %19 {strides = array<i32>} : memref<4x256xf32, #tpu.memory_space<vmem>>, vector<4x256xf32>,
    } else {
    }
    return
  }
  func.func @transform_0(%arg0: i32, %arg1: i32) -> (i32, i32) {
    %c0_i32 = arith.constant 0 : i32
    %c0_i32_0 = arith.constant 0 : i32
    return %c0_i32, %arg1 : i32, i32
  }
  func.func @transform_1(%arg0: i32, %arg1: i32) -> (i32, i32) {
    %c0_i32 = arith.constant 0 : i32
    return %arg1, %arg0 : i32, i32
  }
  func.func @transform_2(%arg0: i32, %arg1: i32) -> (i32, i32) {
    %c0_i32 = arith.constant 0 : i32
    %c0_i32_0 = arith.constant 0 : i32
    %c0_i32_1 = arith.constant 0 : i32
    return %c0_i32, %c0_i32_0 : i32, i32
  }
  func.func @transform_3(%arg0: i32, %arg1: i32) -> (i32, i32) {
    %c0_i32 = arith.constant 0 : i32
    %c0_i32_0 = arith.constant 0 : i32
    return %c0_i32, %arg0 : i32, i32
  }
}

module attributes {stable_mosaic.version = 11 : i64} {
  func.func @_matmul_bias_kernel(%arg0: i32, %arg1: i32, %arg2: memref<2x3072xbf16, #tpu.memory_space<vmem>>, %arg3: memref<3072x128xbf16, #tpu.memory_space<vmem>>, %arg4: memref<1x128xf32, #tpu.memory_space<vmem>>, %arg5: memref<2x128xf32, #tpu.memory_space<vmem>>, %arg6: memref<2x128xf32, #tpu.memory_space<vmem>>) attributes {dimension_semantics = [#tpu.dimension_semantics<parallel>, #tpu.dimension_semantics<arbitrary>], iteration_bounds = array<i64: 1, 1>, scalar_prefetch = 0 : i64, scratch_operands = 1 : i64, tpu.core_type = #tpu.core_type<tc>, window_params = [{transform_indices = @transform_0, window_bounds = array<i64: 2, 3072>}, {transform_indices = @transform_1, window_bounds = array<i64: 3072, 128>}, {transform_indices = @transform_2, window_bounds = array<i64: 1, 128>}, {transform_indices = @transform_3, window_bounds = array<i64: 2, 128>}]} {
    %c0_i32 = arith.constant 0 : i32
    %0 = arith.cmpi eq, %arg1, %c0_i32 : i32
    %1 = arith.extui %0 : i1 to i32
    %c0_i32_0 = arith.constant 0 : i32
    %2 = arith.cmpi ne, %1, %c0_i32_0 : i32
    scf.if %2 {
      %cst_10 = arith.constant 0.000000e+00 : f32
      %14 = vector.broadcast %cst_10 : f32 to vector<2x128xf32>
      %c0_11 = arith.constant 0 : index
      %c0_12 = arith.constant 0 : index
      %15 = vector.load %arg6[%c0_11, %c0_12] : memref<2x128xf32, #tpu.memory_space<vmem>>, vector<2x128xf32>
      tpu.vector_store %arg6[%c0_11, %c0_12], %14 {strides = array<i32>} : memref<2x128xf32, #tpu.memory_space<vmem>>, vector<2x128xf32>,
    } else {
    }
    %c0 = arith.constant 0 : index
    %c0_1 = arith.constant 0 : index
    %3 = vector.load %arg6[%c0, %c0_1] : memref<2x128xf32, #tpu.memory_space<vmem>>, vector<2x128xf32>
    %c0_2 = arith.constant 0 : index
    %c0_3 = arith.constant 0 : index
    %4 = vector.load %arg2[%c0_2, %c0_3] : memref<2x3072xbf16, #tpu.memory_space<vmem>>, vector<2x3072xbf16>
    %5 = arith.extf %4 : vector<2x3072xbf16> to vector<2x3072xf32>
    %c0_4 = arith.constant 0 : index
    %c0_5 = arith.constant 0 : index
    %6 = vector.load %arg3[%c0_4, %c0_5] : memref<3072x128xbf16, #tpu.memory_space<vmem>>, vector<3072x128xbf16>
    %7 = arith.extf %6 : vector<3072x128xbf16> to vector<3072x128xf32>
    %cst = arith.constant dense<0.000000e+00> : vector<2x128xf32>
    %8 = tpu.matmul %5, %7, %cst {dimension_numbers = #tpu.dot_dimension_numbers<[1], [0], [0], [1], [0, 0, 1, 1], [], []>} : vector<2x3072xf32>, vector<3072x128xf32>, vector<2x128xf32> -> vector<2x128xf32>
    %9 = arith.addf %3, %8 : vector<2x128xf32>
    %c0_6 = arith.constant 0 : index
    %c0_7 = arith.constant 0 : index
    %10 = vector.load %arg6[%c0_6, %c0_7] : memref<2x128xf32, #tpu.memory_space<vmem>>, vector<2x128xf32>
    tpu.vector_store %arg6[%c0_6, %c0_7], %9 {strides = array<i32>} : memref<2x128xf32, #tpu.memory_space<vmem>>, vector<2x128xf32>,
    %c0_i32_8 = arith.constant 0 : i32
    %11 = arith.cmpi eq, %arg1, %c0_i32_8 : i32
    %12 = arith.extui %11 : i1 to i32
    %c0_i32_9 = arith.constant 0 : i32
    %13 = arith.cmpi ne, %12, %c0_i32_9 : i32
    scf.if %13 {
      %c0_10 = arith.constant 0 : index
      %c0_11 = arith.constant 0 : index
      %14 = vector.load %arg6[%c0_10, %c0_11] : memref<2x128xf32, #tpu.memory_space<vmem>>, vector<2x128xf32>
      %c0_12 = arith.constant 0 : index
      %c0_13 = arith.constant 0 : index
      %15 = vector.load %arg4[%c0_12, %c0_13] : memref<1x128xf32, #tpu.memory_space<vmem>>, vector<1x128xf32>
      %16 = vector.broadcast %15 : vector<1x128xf32> to vector<2x128xf32>
      %17 = arith.addf %14, %16 : vector<2x128xf32>
      %cst_14 = arith.constant 1.000000e+00 : f32
      %18 = vector.broadcast %cst_14 : f32 to vector<2x128xf32>
      %19 = arith.mulf %17, %18 : vector<2x128xf32>
      %c0_15 = arith.constant 0 : index
      %c0_16 = arith.constant 0 : index
      %20 = vector.load %arg5[%c0_15, %c0_16] : memref<2x128xf32, #tpu.memory_space<vmem>>, vector<2x128xf32>
      tpu.vector_store %arg5[%c0_15, %c0_16], %19 {strides = array<i32>} : memref<2x128xf32, #tpu.memory_space<vmem>>, vector<2x128xf32>,
    } else {
    }
    return
  }
  func.func @transform_0(%arg0: i32, %arg1: i32) -> (i32, i32) {
    %c0_i32 = arith.constant 0 : i32
    %c0_i32_0 = arith.constant 0 : i32
    return %c0_i32, %arg1 : i32, i32
  }
  func.func @transform_1(%arg0: i32, %arg1: i32) -> (i32, i32) {
    %c0_i32 = arith.constant 0 : i32
    return %arg1, %arg0 : i32, i32
  }
  func.func @transform_2(%arg0: i32, %arg1: i32) -> (i32, i32) {
    %c0_i32 = arith.constant 0 : i32
    %c0_i32_0 = arith.constant 0 : i32
    return %c0_i32, %arg0 : i32, i32
  }
  func.func @transform_3(%arg0: i32, %arg1: i32) -> (i32, i32) {
    %c0_i32 = arith.constant 0 : i32
    %c0_i32_0 = arith.constant 0 : i32
    return %c0_i32, %arg0 : i32, i32
  }
}

module attributes {stable_mosaic.version = 11 : i64} {
  func.func @_diffusion_loss_kernel(%arg0: i32, %arg1: i32, %arg2: memref<2x6xf32, #tpu.memory_space<smem>>, %arg3: memref<1x1x4x16xf32, #tpu.memory_space<vmem>>, %arg4: memref<1x1x4x16xf32, #tpu.memory_space<vmem>>, %arg5: memref<1x1x4x16xf32, #tpu.memory_space<vmem>>, %arg6: memref<1x1x4x1xf32, #tpu.memory_space<vmem>>, %arg7: memref<4x8xf32, #tpu.memory_space<vmem>>, %arg8: memref<1x1x4x16xf32, #tpu.memory_space<vmem>>, %arg9: memref<1x1x1x1xf32, #tpu.memory_space<vmem>>) attributes {dimension_semantics = [#tpu.dimension_semantics<parallel>, #tpu.dimension_semantics<parallel>], iteration_bounds = array<i64: 2, 8>, scalar_prefetch = 0 : i64, scratch_operands = 0 : i64, tpu.core_type = #tpu.core_type<tc>, window_params = [{transform_indices = @transform_0, window_bounds = array<i64: 2, 6>}, {transform_indices = @transform_1, window_bounds = array<i64: 1, 1, 4, 16>}, {transform_indices = @transform_2, window_bounds = array<i64: 1, 1, 4, 16>}, {transform_indices = @transform_3, window_bounds = array<i64: 1, 1, 4, 16>}, {transform_indices = @transform_4, window_bounds = array<i64: 1, 1, 4, 1>}, {pipeline_mode = #tpu.pipeline_mode<synchronous>, transform_indices = @transform_5, window_bounds = array<i64: 4, 8>}, {transform_indices = @transform_6, window_bounds = array<i64: 1, 1, 4, 16>}, {transform_indices = @transform_7, window_bounds = array<i64: 1, 1, 1, 1>}]} {
    %0 = arith.index_cast %arg0 : i32 to index
    %c0 = arith.constant 0 : index
    %1 = memref.load %arg2[%0, %c0] : memref<2x6xf32, #tpu.memory_space<smem>>
    %2 = arith.index_cast %arg0 : i32 to index
    %c1 = arith.constant 1 : index
    %3 = memref.load %arg2[%2, %c1] : memref<2x6xf32, #tpu.memory_space<smem>>
    %4 = arith.index_cast %arg0 : i32 to index
    %c2 = arith.constant 2 : index
    %5 = memref.load %arg2[%4, %c2] : memref<2x6xf32, #tpu.memory_space<smem>>
    %6 = arith.index_cast %arg0 : i32 to index
    %c3 = arith.constant 3 : index
    %7 = memref.load %arg2[%6, %c3] : memref<2x6xf32, #tpu.memory_space<smem>>
    %8 = arith.index_cast %arg0 : i32 to index
    %c4 = arith.constant 4 : index
    %9 = memref.load %arg2[%8, %c4] : memref<2x6xf32, #tpu.memory_space<smem>>
    %10 = arith.index_cast %arg0 : i32 to index
    %c5 = arith.constant 5 : index
    %11 = memref.load %arg2[%10, %c5] : memref<2x6xf32, #tpu.memory_space<smem>>
    %c0_0 = arith.constant 0 : index
    %c0_1 = arith.constant 0 : index
    %c0_2 = arith.constant 0 : index
    %c0_3 = arith.constant 0 : index
    %12 = vector.load %arg3[%c0_0, %c0_1, %c0_2, %c0_3] : memref<1x1x4x16xf32, #tpu.memory_space<vmem>>, vector<1x1x4x16xf32>
    %13 = vector.shape_cast %12 : vector<1x1x4x16xf32> to vector<4x16xf32>
    %c0_4 = arith.constant 0 : index
    %c0_5 = arith.constant 0 : index
    %c0_6 = arith.constant 0 : index
    %c0_7 = arith.constant 0 : index
    %14 = vector.load %arg5[%c0_4, %c0_5, %c0_6, %c0_7] : memref<1x1x4x16xf32, #tpu.memory_space<vmem>>, vector<1x1x4x16xf32>
    %15 = vector.shape_cast %14 : vector<1x1x4x16xf32> to vector<4x16xf32>
    %16 = vector.broadcast %1 : f32 to vector<4x16xf32>
    %17 = arith.mulf %16, %15 : vector<4x16xf32>
    %18 = arith.addf %13, %17 : vector<4x16xf32>
    %c0_8 = arith.constant 0 : index
    %c0_9 = arith.constant 0 : index
    %c0_10 = arith.constant 0 : index
    %c0_11 = arith.constant 0 : index
    %19 = vector.load %arg4[%c0_8, %c0_9, %c0_10, %c0_11] : memref<1x1x4x16xf32, #tpu.memory_space<vmem>>, vector<1x1x4x16xf32>
    %20 = vector.shape_cast %19 : vector<1x1x4x16xf32> to vector<4x16xf32>
    %cst = arith.constant 5.4899807 : f32
    %21 = vector.broadcast %cst : f32 to vector<4x16xf32>
    %22 = arith.mulf %20, %21 : vector<4x16xf32>
    %c0_12 = arith.constant 0 : index
    %c0_13 = arith.constant 0 : index
    %23 = vector.load %arg7[%c0_12, %c0_13] : memref<4x8xf32, #tpu.memory_space<vmem>>, vector<4x4xf32>
    %c0_14 = arith.constant 0 : index
    %c4_15 = arith.constant 4 : index
    %24 = vector.load %arg7[%c0_14, %c4_15] : memref<4x8xf32, #tpu.memory_space<vmem>>, vector<4x4xf32>
    %25 = vector.broadcast %3 : f32 to vector<4x16xf32>
    %26 = arith.mulf %25, %18 : vector<4x16xf32>
    %cst_16 = arith.constant dense<0.000000e+00> : vector<4x16xf32>
    %27 = tpu.matmul %23, %26, %cst_16 {dimension_numbers = #tpu.dot_dimension_numbers<[1], [0], [0], [1], [0, 0, 1, 1], [], []>} : vector<4x4xf32>, vector<4x16xf32>, vector<4x16xf32> -> vector<4x16xf32>
    %cst_17 = arith.constant dense<0.000000e+00> : vector<4x16xf32>
    %28 = tpu.matmul %24, %22, %cst_17 {dimension_numbers = #tpu.dot_dimension_numbers<[1], [0], [0], [1], [0, 0, 1, 1], [], []>} : vector<4x4xf32>, vector<4x16xf32>, vector<4x16xf32> -> vector<4x16xf32>
    %29 = arith.addf %27, %28 : vector<4x16xf32>
    %c0_18 = arith.constant 0 : index
    %c0_19 = arith.constant 0 : index
    %c0_20 = arith.constant 0 : index
    %c0_21 = arith.constant 0 : index
    %30 = vector.load %arg6[%c0_18, %c0_19, %c0_20, %c0_21] : memref<1x1x4x1xf32, #tpu.memory_space<vmem>>, vector<1x1x4x1xf32>
    %31 = vector.shape_cast %30 : vector<1x1x4x1xf32> to vector<4x1xf32>
    %32 = vector.broadcast %31 : vector<4x1xf32> to vector<4x16xf32>
    %33 = arith.addf %29, %32 : vector<4x16xf32>
    %34 = vector.broadcast %9 : f32 to vector<4x16xf32>
    %35 = arith.addf %33, %34 : vector<4x16xf32>
    %36 = vector.broadcast %5 : f32 to vector<4x16xf32>
    %37 = arith.mulf %36, %35 : vector<4x16xf32>
    %38 = vector.broadcast %7 : f32 to vector<4x16xf32>
    %39 = arith.mulf %38, %18 : vector<4x16xf32>
    %40 = arith.addf %37, %39 : vector<4x16xf32>
    %c0_22 = arith.constant 0 : index
    %c0_23 = arith.constant 0 : index
    %c0_24 = arith.constant 0 : index
    %c0_25 = arith.constant 0 : index
    %41 = vector.load %arg8[%c0_22, %c0_23, %c0_24, %c0_25] : memref<1x1x4x16xf32, #tpu.memory_space<vmem>>, vector<1x1x4x16xf32>
    %42 = vector.shape_cast %41 : vector<1x1x4x16xf32> to vector<4x16xf32>
    %43 = vector.shape_cast %40 : vector<4x16xf32> to vector<1x1x4x16xf32>
    tpu.vector_store %arg8[%c0_22, %c0_23, %c0_24, %c0_25], %43 {strides = array<i32>} : memref<1x1x4x16xf32, #tpu.memory_space<vmem>>, vector<1x1x4x16xf32>,
    %44 = arith.subf %40, %13 : vector<4x16xf32>
    %45 = arith.mulf %44, %44 : vector<4x16xf32>
    %46 = vector.shape_cast %45 : vector<4x16xf32> to vector<1x4x16xf32>
    %cst_26 = arith.constant dense<0.000000e+00> : vector<1xf32>
    %47 = vector.multi_reduction <add>, %46, %cst_26 [1, 2] : vector<1x4x16xf32> to vector<1xf32>
    %48 = vector.shape_cast %47 : vector<1xf32> to vector<1x1x1xf32>
    %49 = vector.extract %48[0, 0, 0] : f32 from vector<1x1x1xf32>
    %50 = arith.mulf %11, %49 : f32
    %51 = vector.broadcast %50 : f32 to vector<1x1x1x1xf32>
    %c0_27 = arith.constant 0 : index
    %c0_28 = arith.constant 0 : index
    %c0_29 = arith.constant 0 : index
    %c0_30 = arith.constant 0 : index
    %52 = vector.load %arg9[%c0_27, %c0_28, %c0_29, %c0_30] : memref<1x1x1x1xf32, #tpu.memory_space<vmem>>, vector<1x1x1x1xf32>
    tpu.vector_store %arg9[%c0_27, %c0_28, %c0_29, %c0_30], %51 {strides = array<i32>} : memref<1x1x1x1xf32, #tpu.memory_space<vmem>>, vector<1x1x1x1xf32>,
    return
  }
  func.func @transform_0(%arg0: i32, %arg1: i32) -> (i32, i32) {
    %c0_i32 = arith.constant 0 : i32
    %c0_i32_0 = arith.constant 0 : i32
    %c0_i32_1 = arith.constant 0 : i32
    return %c0_i32, %c0_i32_0 : i32, i32
  }
  func.func @transform_1(%arg0: i32, %arg1: i32) -> (i32, i32, i32, i32) {
    %c0_i32 = arith.constant 0 : i32
    %c0_i32_0 = arith.constant 0 : i32
    %c0_i32_1 = arith.constant 0 : i32
    return %arg0, %arg1, %c0_i32, %c0_i32_0 : i32, i32, i32, i32
  }
  func.func @transform_2(%arg0: i32, %arg1: i32) -> (i32, i32, i32, i32) {
    %c0_i32 = arith.constant 0 : i32
    %c0_i32_0 = arith.constant 0 : i32
    %c0_i32_1 = arith.constant 0 : i32
    %c0_i32_2 = arith.constant 0 : i32
    return %arg0, %c0_i32, %c0_i32_0, %c0_i32_1 : i32, i32, i32, i32
  }
  func.func @transform_3(%arg0: i32, %arg1: i32) -> (i32, i32, i32, i32) {
    %c0_i32 = arith.constant 0 : i32
    %c0_i32_0 = arith.constant 0 : i32
    %c0_i32_1 = arith.constant 0 : i32
    return %arg0, %arg1, %c0_i32, %c0_i32_0 : i32, i32, i32, i32
  }
  func.func @transform_4(%arg0: i32, %arg1: i32) -> (i32, i32, i32, i32) {
    %c0_i32 = arith.constant 0 : i32
    %c0_i32_0 = arith.constant 0 : i32
    %c0_i32_1 = arith.constant 0 : i32
    return %arg0, %arg1, %c0_i32, %c0_i32_0 : i32, i32, i32, i32
  }
  func.func @transform_5(%arg0: i32, %arg1: i32) -> (i32, i32) {
    %c0_i32 = arith.constant 0 : i32
    %c0_i32_0 = arith.constant 0 : i32
    %c0_i32_1 = arith.constant 0 : i32
    return %c0_i32, %c0_i32_0 : i32, i32
  }
  func.func @transform_6(%arg0: i32, %arg1: i32) -> (i32, i32, i32, i32) {
    %c0_i32 = arith.constant 0 : i32
    %c0_i32_0 = arith.constant 0 : i32
    %c0_i32_1 = arith.constant 0 : i32
    return %arg0, %arg1, %c0_i32, %c0_i32_0 : i32, i32, i32, i32
  }
  func.func @transform_7(%arg0: i32, %arg1: i32) -> (i32, i32, i32, i32) {
    %c0_i32 = arith.constant 0 : i32
    %c0_i32_0 = arith.constant 0 : i32
    %c0_i32_1 = arith.constant 0 : i32
    return %arg0, %arg1, %c0_i32, %c0_i32_0 : i32, i32, i32, i32
  }
}

</mosaic_0001>

<bundles_post_ra>
// kernel: sv3d_compute_loss.13
= control target key start
LH: loop header
LB: loop body
LE: loop exit
PB: predicated region body
PF: predicated region fallthrough
CT: control target
= control target key end

     0   :  { %v204_v3 = vmov 0   ;;  %vm96_vm0 = vcmask 523264   ;;  %s312_s1 = inlined_call_operand.vmem [shape: bf16[192,256], index: 1, kind: input, shape index: {}]   ;;  %s313_s2 = inlined_call_operand.vmem [shape: f32[4,1], index: 2, kind: input, shape index: {}]   ;;  %s314_s0 = inlined_call_operand.vmem [shape: bf16[4,192], index: 0, kind: input, shape index: {}]   ;;  %s315_s3 = inlined_call_operand.vmem [shape: f32[4,256], index: 3, kind: output, shape index: {}]  }
   0x1   :  { %v37_v0 = vld [vmem:[%s312_s1 + $0x78] sm:$0xff]  ;;  %v36_v1 = vld [vmem:[%s312_s1 + $0x70] sm:$0xff]  ;;  %v35_v2 = vld [vmem:[%s312_s1 + $0x68] sm:$0xff]  ;;  %203 = vset.pattern.permute.xlu0 %v204_v3 }
   0x2   :  { %v77_v4 = vunpack.c.h.bf16 %v37_v0  ;;  %v76_v5 = vunpack.c.l.bf16 %v37_v0  ;;  %v75_v6 = vunpack.c.h.bf16 %v36_v1  ;;  %v74_v7 = vunpack.c.l.bf16 %v36_v1  ;;  %v34_v8 = vld [vmem:[%s312_s1 + $0x60] sm:$0xff]  ;;  %v33_v11 = vld [vmem:[%s312_s1 + $0x58] sm:$0xff]  ;;  %v32_v14 = vld [vmem:[%s312_s1 + $0x50] sm:$0xff] }
   0x3   :  { %v73_v9 = vunpack.c.h.bf16 %v35_v2  ;;  %v72_v10 = vunpack.c.l.bf16 %v35_v2  ;;  %v71_v12 = vunpack.c.h.bf16 %v34_v8  ;;  %v70_v13 = vunpack.c.l.bf16 %v34_v8  ;;  %v31_v17 = vld [vmem:[%s312_s1 + $0x48] sm:$0xff]  ;;  %v180_v18 = vld [vmem:[%s313_s2] sm:$0xf]  ;;  %v29_v25 = vld [vmem:[%s312_s1 + $0x38] sm:$0xff] }
   0x4   :  { %99 = vmatprep.subr.mxu0 %v77_v4  ;;  %v69_v15 = vunpack.c.h.bf16 %v33_v11  ;;  %v68_v16 = vunpack.c.l.bf16 %v33_v11  ;;  %v67_v19 = vunpack.c.h.bf16 %v32_v14  ;;  %183 = vperm.xlu0 %203, %v180_v18   ;;  %v66_v20 = vunpack.c.l.bf16 %v32_v14  ;;  %v30_v21 = vld [vmem:[%s312_s1 + $0x40] sm:$0xff]  ;;  %v28_v29 = vld [vmem:[%s312_s1 + $0x30] sm:$0xff]  ;;  %v27_v33 = vld [vmem:[%s312_s1 + $0x28] sm:$0xff] }
   0x5   :  { %100 = vmatpush1.msra.mxu0 %v76_v5  ;;  %v20_v22 = vld [vmem:[%s314_s0] sm:$0xf]  ;;  %v65_v23 = vunpack.c.h.bf16 %v31_v17  ;;  %v64_v24 = vunpack.c.l.bf16 %v31_v17  ;;  %v63_v26 = vunpack.c.h.bf16 %v30_v21  ;;  %v62_v28 = vunpack.c.l.bf16 %v30_v21  ;;  %v25_v39 = vld [vmem:[%s312_s1 + $0x18] sm:$0xff]  ;;  %v24_v42 = vld [vmem:[%s312_s1 + $0x10] sm:$0xff] }
   0x6   :  { %101 = vmatprep.subr.mxu0 %v75_v6  ;;  %v259_v27 = vunpack.c.l.bf16 %v20_v22  ;;  %v61_v30 = vunpack.c.h.bf16 %v29_v25  ;;  %v60_v32 = vunpack.c.l.bf16 %v29_v25  ;;  %v59_v34 = vunpack.c.h.bf16 %v28_v29  ;;  %v26_v36 = vld [vmem:[%s312_s1 + $0x20] sm:$0xff]  ;;  %v23_v45 = vld [vmem:[%s312_s1 + $0x8] sm:$0xff]  ;;  %v45_v51 = vld [vmem:[%s312_s1 + $0xb8] sm:$0xff] }
   0x7   :  { %102 = vmatpush1.msra.mxu0 %v74_v7  ;;  %v58_v35 = vunpack.c.l.bf16 %v28_v29  ;;  %v57_v37 = vunpack.c.h.bf16 %v27_v33  ;;  %v56_v38 = vunpack.c.l.bf16 %v27_v33  ;;  %v55_v40 = vunpack.c.h.bf16 %v26_v36  ;;  %v22_v48 = vld [vmem:[%s312_s1] sm:$0xff]  ;;  %v44_v54 = vld [vmem:[%s312_s1 + $0xb0] sm:$0xff]  ;;  %v43_v57 = vld [vmem:[%s312_s1 + $0xa8] sm:$0xff] }
   0x8   :  { %103 = vmatprep.subr.mxu0 %v73_v9  ;;  %v95_v31 = vcombine.high %v259_v27, %v259_v27  ;;  %v54_v41 = vunpack.c.l.bf16 %v26_v36  ;;  %v53_v43 = vunpack.c.h.bf16 %v25_v39  ;;  %v52_v44 = vunpack.c.l.bf16 %v25_v39  ;;  %v42_v60 = vld [vmem:[%s312_s1 + $0xa0] sm:$0xff]  ;;  %v41_v63 = vld [vmem:[%s312_s1 + $0x98] sm:$0xff]  ;;  %v40_v2 = vld [vmem:[%s312_s1 + $0x90] sm:$0xff] }
   0x9   :  { %104 = vmatpush1.msra.mxu0 %v72_v10  ;;  %v51_v46 = vunpack.c.h.bf16 %v24_v42  ;;  %v50_v47 = vunpack.c.l.bf16 %v24_v42  ;;  %v49_v49 = vunpack.c.h.bf16 %v23_v45  ;;  %v48_v50 = vunpack.c.l.bf16 %v23_v45  ;;  %v39_v5 = vld [vmem:[%s312_s1 + $0x88] sm:$0xff]  ;;  %v38_v8 = vld [vmem:[%s312_s1 + $0x80] sm:$0xff] }
   0xa   :  { %105 = vmatprep.subr.mxu0 %v71_v12  ;;  %200 = vmatprep.mubr.msk.f32.mxu0 %vm96_vm0, %v95_v31  ;;  %v47_v52 = vunpack.c.h.bf16 %v22_v48  ;;  %v46_v53 = vunpack.c.l.bf16 %v22_v48  ;;  %v93_v55 = vunpack.c.h.bf16 %v45_v51  ;;  %v92_v56 = vunpack.c.l.bf16 %v45_v51 }
   0xb   :  { %106 = vmatpush1.msra.mxu0 %v70_v13  ;;  %v91_v58 = vunpack.c.h.bf16 %v44_v54  ;;  %v90_v59 = vunpack.c.l.bf16 %v44_v54  ;;  %v89_v61 = vunpack.c.h.bf16 %v43_v57  ;;  %v88_v62 = vunpack.c.l.bf16 %v43_v57 }
   0xc   :  { %107 = vmatprep.subr.mxu0 %v69_v15  ;;  %v87_v0 = vunpack.c.h.bf16 %v42_v60  ;;  %v86_v1 = vunpack.c.l.bf16 %v42_v60  ;;  %v85_v3 = vunpack.c.h.bf16 %v41_v63  ;;  %v84_v4 = vunpack.c.l.bf16 %v41_v63 }
   0xd   :  { %108 = vmatpush1.msra.mxu0 %v68_v16  ;;  %v83_v6 = vunpack.c.h.bf16 %v40_v2  ;;  %v82_v7 = vunpack.c.l.bf16 %v40_v2  ;;  %v81_v9 = vunpack.c.h.bf16 %v39_v5  ;;  %v80_v10 = vunpack.c.l.bf16 %v39_v5 }
   0xe   :  { %109 = vmatprep.subr.mxu0 %v67_v19  ;;  %v79_v11 = vunpack.c.h.bf16 %v38_v8  ;;  %v78_v12 = vunpack.c.l.bf16 %v38_v8  ;;  %v205_v13 = vmov 839922192   ;;  %v188_v15 = vlaneseq }
   0xf   :  { %110 = vmatpush1.msra.mxu0 %v66_v20  ;;  %v186_v14 = vunpack.c.l.s4 %v205_v13 }
  0x10   :  { %111 = vmatprep.subr.mxu0 %v65_v23  ;;  %v189_v17 = vshrl.u32 %v188_v15, 7 }
  0x11   :  { %112 = vmatpush1.msra.mxu0 %v64_v24  ;;  %v187_v16 = vunpack.c.0.s8 %v186_v14 }
  0x12   :  { %113 = vmatprep.subr.mxu0 %v63_v26 }
  0x13   :  { %114 = vmatpush1.msra.mxu0 %v62_v28  ;;  %v190_v18 = vsub.s32 %v187_v16, %v189_v17 }
  0x14   :  { %115 = vmatprep.subr.mxu0 %v61_v30 }
  0x15   :  { %116 = vmatpush1.msra.mxu0 %v60_v32 }
  0x16   :  { %117 = vmatprep.subr.mxu0 %v59_v34 }
  0x17   :  { %118 = vmatpush1.msra.mxu0 %v58_v35 }
  0x18   :  { %119 = vmatprep.subr.mxu0 %v57_v37 }
  0x19   :  { %120 = vmatpush1.msra.mxu0 %v56_v38 }
  0x1a   :  { %121 = vmatprep.subr.mxu0 %v55_v40 }
  0x1b   :  { %122 = vmatpush1.msra.mxu0 %v54_v41 }
  0x1c   :  { %123 = vmatprep.subr.mxu0 %v53_v43 }
  0x1d   :  { %124 = vmatpush1.msra.mxu0 %v52_v44 }
  0x1e   :  { %125 = vmatprep.subr.mxu0 %v51_v46 }
  0x1f   :  { %126 = vmatpush1.msra.mxu0 %v50_v47 }
  0x20   :  { %127 = vmatprep.subr.mxu0 %v49_v49 }
  0x21   :  { %128 = vmatpush1.msra.mxu0 %v48_v50 }
  0x22   :  { %129 = vmatprep.subr.mxu0 %v47_v52 }
  0x23   :  { %130 = vmatpush1.msra.mxu0 %v46_v53 }
  0x24   :  { %147 = vmatprep.subr.mxu0 %v93_v55 }
  0x25   :  { %148 = vmatpush2.msra.mxu0 %v92_v56 }
  0x26   :  { %149 = vmatprep.subr.mxu0 %v91_v58 }
  0x27   :  { %150 = vmatpush2.msra.mxu0 %v90_v59 }
  0x28   :  { %151 = vmatprep.subr.mxu0 %v89_v61 }
  0x29   :  { %152 = vmatpush2.msra.mxu0 %v88_v62 }
  0x2a   :  { %153 = vmatprep.subr.mxu0 %v87_v0 }
  0x2b   :  { %154 = vmatpush2.msra.mxu0 %v86_v1 }
  0x2c   :  { %155 = vmatprep.subr.mxu0 %v85_v3 }
  0x2d   :  { %156 = vmatpush2.msra.mxu0 %v84_v4 }
  0x2e   :  { %157 = vmatprep.subr.mxu0 %v83_v6 }
  0x2f   :  { %158 = vmatpush2.msra.mxu0 %v82_v7 }
  0x30   :  { %159 = vmatprep.subr.mxu0 %v81_v9 }
  0x31   :  { %160 = vmatpush2.msra.mxu0 %v80_v10 }
  0x32   :  { %161 = vmatprep.subr.mxu0 %v79_v11 }
  0x33   :  { %162 = vmatpush2.msra.mxu0 %v78_v12 }
  0x34   :  { %164 = vmatmul.mubr.f32.vlgmr.msra.gmra.mxu0 %v259_v27 }
  0x7f   :  { %v184_v19 = vpop.permute.xlu0 %183 }
  0x80   :  { %v191_v21 = vrot.slane %v184_v19, %v190_v18 }
  0xf4   :  { %v165_v20 = vpop.f32.mrf.mxu0 }
  0xf6   :  { %v167_v22 = vpop.f32.mrf.mxu0 }
  0xf7   :  { %v172_v23 = vcombine.low %v165_v20, %v167_v22 }
  0xf9   :  { %v193_v24 = vadd.f32 %v191_v21, %v172_v23 }
  0xfb   :  { %v194_v25 = vmul.f32 0.18215, %v193_v24 }
  0xfd   :  { %195 = vst [vmem:[%s315_s3] sm:$0xff] %v194_v25 }

// kernel: sv3d_compute_loss.15
= control target key start
LH: loop header
LB: loop body
LE: loop exit
PB: predicated region body
PF: predicated region fallthrough
CT: control target
= control target key end

     0   :  { %s1139_s0 = inlined_call_operand.vmem [shape: f32[2,6], index: 0, kind: input, shape index: {}]   ;;  %s1140_s1 = inlined_call_operand.vmem [shape: f32[2,8,4,16], index: 1, kind: input, shape index: {}, may-alias: {1,2}]   ;;  %s1141_s2 = inlined_call_operand.vmem [shape: f32[2,8,4,16], index: 2, kind: input, shape index: {}, may-alias: {1,2}]   ;;  %s1142_s3 = inlined_call_operand.vmem [shape: f32[2,8,4,16], index: 3, kind: input, shape index: {}]   ;;  %s1143_s4 = inlined_call_operand.vmem [shape: f32[2,8,4,1], index: 4, kind: input, shape index: {}]   ;;  %s1144_s5 = inlined_call_operand.vmem [shape: f32[4,8], index: 5, kind: input, shape index: {}]   ;;  %s1145_s6 = inlined_call_operand.vmem [shape: f32[2,8,4,16], index: 6, kind: output, shape index: {0}]   ;;  %s1146_s7 = inlined_call_operand.vmem [shape: f32[2,8,1,1], index: 7, kind: output, shape index: {1}]  }
   0x1   :  { %1147 = sst [smem:[#allocation5_spill]] %s1139_s0 }
   0x2   :  { %1148 = sst [smem:[#allocation6_spill]] %s1144_s5 }
   0x3   :  { %13 = vsyncpa [#allocation3], 0  ;;  %s1024_s24 = smov 0   ;;  %s1026_s25 = smov 0  }
   0x4   :  { %s1028_s26 = smov 0   ;;  %s1030_s27 = smov 0  }
   0x5   :  { %s1032_s28 = smov 0  }
   0x6 LB: > { %s822_s29 = sadd.s32 4294967295, %s977_s28   ;;  %s28_s30 = sadd.s32 1, %s969_s26  ;;  %s977_s28 = sphi %s1032_s28, %s19_s28   ;;  %s973_s27 = sphi %s1030_s27, %s1156_s27   ;;  %s969_s26 = sphi %s1028_s26, %s1155_s26   ;;  %s965_s25 = sphi %s1026_s25, %s1154_s25   ;;  %s961_s24 = sphi %s1024_s24, %s1153_s24  }
   0x7   : > { %p29_p0 = scmp.ge.s32.totalorder %s28_s30, 8  ;;  %s31_s8 = sadd.s32 1, %s973_s27 }
   0x8   : > { %p824_p1 = scmp.ge.s32.totalorder %s977_s28, 1  ;;  %p244_p2 = scmp.lt.s32.totalorder %s977_s28, 17 }
   0x9   : > { %s1158_s30 = smov (%p29_p0, %s28_s30), 0  ;;  %s1160_s8 = smov (!%p29_p0, %s31_s8), %s973_s27 }
   0xa   : > { %p1057_p3 = pnand %p824_p1, %p244_p2  ;;  %p33_p4 = scmp.ge.s32.totalorder %s1160_s8, 2 }
   0xb   : > { %p1061_p5 = scmp.eq.s32.totalorder %s822_s29, 0  ;;  %s1151_s0 = sld [smem:[#allocation5_spill]] }
   0xc   : > { %p868_p6 = pneg %p1057_p3  ;;  %s1162_s8 = smov (%p33_p4, %s1160_s8), 0 }
   0xe   : > { %p869_p7 = pnand %p1061_p5, %p868_p6 }
  0x10   : > { %p922_p9 = pneg %p869_p7 }
  0x11   : > { %s257_s13 = sshll.u32 %s1151_s0, 4  ;;  %s258_s13 = int_to_ptr.vmem [resolvable:$true] %s257_s13 }
  0x12   : > { %s920_s14 = scalar_lea.vmem %s258_s13, 32  ;;  %p928_p12 = scmp.lt.s32.totalorder %s258_s13, %s258_s13 }
  0x13   : > { %p921_p8 = scmp.ne.s32.totalorder %s258_s13, %s920_s14  ;;  %p929_p13 = scmp.lt.s32.totalorder %s920_s14, %s920_s14 }
  0x15   : > { %p923_p10 = pnand %p922_p9, %p921_p8  ;;  %p930_p0 = por %p929_p13, %p928_p12 }
  0x17   : > { %p924_p11 = pneg %p923_p10 }
  0x19   : > { %p931_p1 = pnand %p930_p0, %p924_p11 }
  0x1b   : > { %934 = shalt.err (!%p931_p1)
}
  0x1c   : > { %s979_s15 = smov [#allocation2]   ;;  %314 = sbr.rel (%p1057_p3) target bundleno = 570 (0x23a), region = 44 }
  0x1d   : > { %871 = dma.vmem_to_smem (!%p869_p7), %s258_s13, 32, %s979_s15, [#allocation3]  }
  0x21   : > { %956 = dma.done.wait (%p1061_p5), [#allocation3], 32  }
  0x22   : > { %958 = vsyncadd (%p1061_p5), [#allocation3], 4294967264 }
  0x23   : > { %320 = sfence }
  0x24   : > { %s1152_s5 = sld [smem:[#allocation6_spill]]  ;;  %p381_p2 = scmp.lt.s32.totalorder %s965_s25, 1  ;;  %v981_v1 = vmov 0.0   ;;  %vm982_vm0 = vmmov 0   ;;  %v983_v2 = vmov 0   ;;  %vm453_vm1 = vcmask 1043456  }
  0x25   : > { %s980_s18 = smov 124   ;;  %857 = vmatprep.subr.mxu1 %v981_v1  ;;  %p383_p3 = scmp.lt.s32.totalorder %s961_s24, 7  ;;  %859 = vmatprep.mubr.msk.f32.mxu1 %vm982_vm0, %v981_v1  ;;  %vm450_vm2 = vcmask 31744   ;;  %vm616_vm3 = vcmask 125952   ;;  %vm632_vm4 = vcmask 0  }
  0x26   : > { %s1086_s19 = sshll.u32 %s965_s25, 7  ;;  %s1164_s25 = smov (!%p381_p2, %s965_s25), 1  ;;  %852 = vmatprep.subr.mxu0 %v981_v1  ;;  %854 = vmatprep.mubr.msk.f32.mxu0 %vm982_vm0, %v981_v1 }
  0x27   : > { %s1166_s24 = smov (!%p383_p3, %s961_s24), 7  ;;  %919 = vset.pattern.permute.xlu0 %v983_v2  ;;  %s829_s20 = sshll.u32 %s1164_s25, 3 }
  0x28   : > { %s426_s21 = sld [smem:[#allocation2 + %s1086_s19]]  ;;  %s1091_s22 = sadd.s32 %s829_s20, %s1166_s24 }
  0x29   : > { %s427_s23 = sadd.s32 1, %s1086_s19  ;;  %s1095_s29 = sshll.u32 %s1091_s22, 2 }
  0x2a   : > { %v444_v0 = vld [vmem:[%s1152_s5] sm:$0xf]  ;;  %s428_s9 = sld [smem:[#allocation2 + %s427_s23]]  ;;  %s388_s12 = scalar_lea.vmem %s1140_s1, %s1095_s29 }
  0x2b   : > { %448 = vrot.lane.b32.xlu0 %v444_v0, %s980_s18  ;;  %s401_s15 = scalar_lea.vmem %s1142_s3, %s1095_s29  ;;  %s847_s16 = sshll.u32 %s1164_s25, 5  ;;  %v437_v5 = vld [vmem:[%s388_s12] sm:$0xf] }
  0x2c   : > { %v438_v3 = vld [vmem:[%s401_s15] sm:$0xf]  ;;  %s409_s18 = scalar_lea.vmem %s1143_s4, %s1095_s29  ;;  %s393_s5 = scalar_lea.vmem %s1141_s2, %s847_s16 }
  0x2d   : > { %v602_v4 = vld [vmem:[%s409_s18] sm:$0xf]  ;;  %s433_s0 = sadd.s32 4, %s1086_s19  ;;  %s429_s25 = sadd.s32 2, %s1086_s19 }
  0x2e   : > { %v439_v6 = vstv %s426_s21  ;;  %v442_v7 = vld [vmem:[%s393_s5] sm:$0xf]  ;;  %s431_s5 = sadd.s32 3, %s1086_s19  ;;  %s434_s21 = sld [smem:[#allocation2 + %s433_s0]] }
  0x2f   : > { %605 = vperm.xlu0 %919, %v602_v4   ;;  %v440_v8 = vmul.f32 %v439_v6, %v438_v3  ;;  %v443_v9 = vmul.f32 5.4899807, %v442_v7  ;;  %s432_s23 = sld [smem:[#allocation2 + %s431_s5]]  ;;  %s417_s12 = scalar_lea.vmem %s1145_s6, %s1095_s29 }
  0x30   : > { %v445_v10 = vstv %s428_s9  ;;  %s430_s10 = sld [smem:[#allocation2 + %s429_s25]]  ;;  %s435_s13 = sadd.s32 5, %s1086_s19 }
  0x31   : > { %v441_v11 = vadd.f32 %v440_v8, %v437_v5  ;;  %853 = vmatpush3.msk.msra.mxu0 %vm453_vm1, %v443_v9  ;;  %s436_s14 = sld [smem:[#allocation2 + %s435_s13]]  ;;  %s424_s24 = scalar_lea.vmem %s1146_s7, %s1091_s22 }
  0x33   : > { %v446_v12 = vmul.f32 %v445_v10, %v441_v11 }
  0x34   : > { %v609_v20 = vstv %s434_s21 }
  0x35   : > { %858 = vmatpush3.msk.msra.mxu1 %vm453_vm1, %v446_v12  ;;  %v613_v21 = vstv %s432_s23 }
  0x36   : > { %860 = vmatmul.mubr.msk.f32.vlgmr.msra.gmra.mxu1 %vm450_vm2, %v444_v0  ;;  %v611_v23 = vstv %s430_s10  ;;  %v614_v25 = vmul.f32 %v613_v21, %v441_v11 }
  0x9d   : > { %v449_v13 = vpop.permute.xlu0 %448 }
  0x9e   : > { %855 = vmatmul.mubr.msk.f32.vlgmr.msra.gmra.mxu0 %vm450_vm2, %v449_v13 }
  0xaa   : > { %v606_v17 = vpop.permute.xlu0 %605 }
  0xf6   : > { %v598_v14 = vpop.f32.mrf.mxu1 }
  0xf8   : > { %v861_v15 = vpop.f32.mrf.mxu1 }
 0x15e   : > { %v523_v16 = vpop.f32.mrf.mxu0 }
 0x15f   : > { %v599_v18 = vadd.f32 %v598_v14, %v523_v16 }
 0x160   : > { %v856_v19 = vpop.f32.mrf.mxu0 }
 0x161   : > { %v608_v22 = vadd.f32 %v606_v17, %v599_v18 }
 0x163   : > { %v610_v24 = vadd.f32 %v609_v20, %v608_v22 }
 0x165   : > { %v612_v26 = vmul.f32 %v611_v23, %v610_v24 }
 0x167   : > { %v615_v27 = vadd.f32 %v614_v25, %v612_v26 }
 0x169   : > { %v618_v28 = vsub.f32 %v615_v27, %v437_v5  ;;  %617 = vst.msk [vmem:[%s417_s12] sm:$0xf] %vm616_vm3, %v615_v27 }
 0x16b   : > { %v619_v29 = vmul.f32 %v618_v28, %v618_v28 }
 0x16d   : > { %v620_v30 = vsel %vm616_vm3, %v619_v29, 0.0 }
 0x16e   : > { %621 = vadd.xlane.f32.xlu1 %v620_v30 }
 0x1f7   : > { %v622_v31 = vpop.xlane.xlu1 %621 }
 0x1f8   : > { %v623_v32 = vrot.slane %v622_v31, 4 }
 0x1fa   : > { %v624_v33 = vadd.f32 %v623_v32, %v622_v31 }
 0x1fc   : > { %v625_v34 = vrot.slane %v624_v33, 2 }
 0x1fe   : > { %v626_v35 = vadd.f32 %v625_v34, %v624_v33 }
 0x200   : > { %v627_v36 = vrot.slane %v626_v35, 1 }
 0x202   : > { %v628_v37 = vadd.f32 %v627_v36, %v626_v35 }
 0x204   : > { %862 = vpush %v628_v37 }
 0x235   : > { %s863_s29 = spop %862 }
 0x236   : > { %s630_s17 = smul.f32 %s863_s29, %s436_s14 }
 0x238   : > { %v631_v38 = vstv %s630_s17 }
 0x239   : > { %633 = vst.msk [vmem:[%s424_s24] sm:$0x1] %vm632_vm4, %v631_v38 }
 0x23a PF: > { %s19_s28 = sadd.s32 1, %s977_s28   ;;  %s1153_s24 = smov %s969_s26 }
 0x23b   : > { %p16_p4 = scmp.ge.s32.totalorder %s19_s28, 18   ;;  %s1154_s25 = smov %s973_s27 }
 0x23c   : > { %s1155_s26 = smov %s1158_s30  ;;  %s1156_s27 = smov %s1162_s8 }
 0x23d   :  { %18 = sbr.rel (!%p16_p4) target bundleno = 6 (0x6), region = 100 }
 0x242   :  { %681 = vsyncpa [#allocation3], 1 }
 0x243   :  { %683 = vsyncpa [#allocation3 + $0x1], 1 }

// kernel: sv3d_compute_loss.14
= control target key start
LH: loop header
LB: loop body
LE: loop exit
PB: predicated region body
PF: predicated region fallthrough
CT: control target
= control target key end

     0   :  { %v3170_v52 = vmov 1983009808   ;;  %v807_v54 = vlaneseq  ;;  %s3809_s1 = inlined_call_operand.vmem [shape: bf16[3072,128], index: 1, kind: input, shape index: {}]   ;;  %s3810_s0 = inlined_call_operand.vmem [shape: bf16[2,3072], index: 0, kind: input, shape index: {}]   ;;  %s3811_s2 = inlined_call_operand.vmem [shape: f32[1,128], index: 2, kind: input, shape index: {}]   ;;  %s3812_s3 = inlined_call_operand.vmem [shape: f32[2,128], index: 3, kind: output, shape index: {}]  }
   0x1   :  { %v2571_v0 = vld [vmem:[%s3809_s1 + $0x78] sm:$0xff]   ;;  %v2570_v8 = vld [vmem:[%s3809_s1 + $0x70] sm:$0xff]   ;;  %v2569_v20 = vld [vmem:[%s3809_s1 + $0x68] sm:$0xff]   ;;  %v805_v53 = vunpack.c.l.s4 %v3170_v52 }
   0x2   :  { %v2587_v1 = vld [vmem:[%s3809_s1 + $0xf8] sm:$0xff]   ;;  %v1851_v3 = vunpack.c.l.bf16 %v2571_v0  ;;  %v1852_v4 = vunpack.c.h.bf16 %v2571_v0  ;;  %v2586_v9 = vld [vmem:[%s3809_s1 + $0xf0] sm:$0xff]   ;;  %v1848_v16 = vunpack.c.h.bf16 %v2570_v8  ;;  %v2585_v21 = vld [vmem:[%s3809_s1 + $0xe8] sm:$0xff]   ;;  %v1847_v22 = vunpack.c.l.bf16 %v2570_v8 }
   0x3   :  { %v2563_v2 = vld [vmem:[%s3809_s1 + $0x38] sm:$0xff]   ;;  %v1915_v5 = vunpack.c.l.bf16 %v2587_v1  ;;  %v1916_v6 = vunpack.c.h.bf16 %v2587_v1  ;;  %v2562_v14 = vld [vmem:[%s3809_s1 + $0x30] sm:$0xff]   ;;  %v1912_v17 = vunpack.c.h.bf16 %v2586_v9  ;;  %v1911_v23 = vunpack.c.l.bf16 %v2586_v9  ;;  %v2561_v24 = vld [vmem:[%s3809_s1 + $0x28] sm:$0xff]  }
   0x4   :  { %v2579_v7 = vld [vmem:[%s3809_s1 + $0xb8] sm:$0xff]   ;;  %v1819_v10 = vunpack.c.l.bf16 %v2563_v2  ;;  %v1820_v11 = vunpack.c.h.bf16 %v2563_v2  ;;  %v2578_v15 = vld [vmem:[%s3809_s1 + $0xb0] sm:$0xff]   ;;  %2748 = vmatprep.subr.mxu0 %v1852_v4  ;;  %v1816_v18 = vunpack.c.h.bf16 %v2562_v14  ;;  %v2577_v25 = vld [vmem:[%s3809_s1 + $0xa8] sm:$0xff]   ;;  %v1815_v26 = vunpack.c.l.bf16 %v2562_v14 }
   0x5   :  { %v1883_v12 = vunpack.c.l.bf16 %v2579_v7  ;;  %v1884_v13 = vunpack.c.h.bf16 %v2579_v7  ;;  %2783 = vmatprep.subr.mxu1 %v1916_v6  ;;  %v1880_v19 = vunpack.c.h.bf16 %v2578_v15  ;;  %v1879_v27 = vunpack.c.l.bf16 %v2578_v15  ;;  %v2568_v32 = vld [vmem:[%s3809_s1 + $0x60] sm:$0xff]   ;;  %v2567_v44 = vld [vmem:[%s3809_s1 + $0x58] sm:$0xff]   ;;  %v2566_v59 = vld [vmem:[%s3809_s1 + $0x50] sm:$0xff]  }
   0x6   :  { %2749 = vmatpush3.msra.mxu0 %v1820_v11  ;;  %v1844_v28 = vunpack.c.h.bf16 %v2569_v20  ;;  %v1908_v29 = vunpack.c.h.bf16 %v2585_v21  ;;  %v1812_v30 = vunpack.c.h.bf16 %v2561_v24  ;;  %v1876_v31 = vunpack.c.h.bf16 %v2577_v25  ;;  %v2584_v33 = vld [vmem:[%s3809_s1 + $0xe0] sm:$0xff]   ;;  %v2583_v45 = vld [vmem:[%s3809_s1 + $0xd8] sm:$0xff]   ;;  %v2582_v60 = vld [vmem:[%s3809_s1 + $0xd0] sm:$0xff]  }
   0x7   :  { %2784 = vmatpush3.msra.mxu1 %v1884_v13  ;;  %2750 = vmatprep.subr.mxu0 %v1851_v3  ;;  %v1843_v34 = vunpack.c.l.bf16 %v2569_v20  ;;  %v1907_v35 = vunpack.c.l.bf16 %v2585_v21  ;;  %v2560_v36 = vld [vmem:[%s3809_s1 + $0x20] sm:$0xff]   ;;  %v1811_v38 = vunpack.c.l.bf16 %v2561_v24  ;;  %v1875_v39 = vunpack.c.l.bf16 %v2577_v25  ;;  %v2559_v48 = vld [vmem:[%s3809_s1 + $0x18] sm:$0xff]   ;;  %v2558_v0 = vld [vmem:[%s3809_s1 + $0x10] sm:$0xff]  }
   0x8   :  { %2785 = vmatprep.subr.mxu1 %v1915_v5  ;;  %2751 = vmatpush3.msra.mxu0 %v1819_v10  ;;  %v2576_v37 = vld [vmem:[%s3809_s1 + $0xa0] sm:$0xff]   ;;  %v1840_v40 = vunpack.c.h.bf16 %v2568_v32  ;;  %v1904_v41 = vunpack.c.h.bf16 %v2584_v33  ;;  %v1808_v42 = vunpack.c.h.bf16 %v2560_v36  ;;  %v1839_v46 = vunpack.c.l.bf16 %v2568_v32  ;;  %v2575_v49 = vld [vmem:[%s3809_s1 + $0x98] sm:$0xff]   ;;  %v2574_v1 = vld [vmem:[%s3809_s1 + $0x90] sm:$0xff]  }
   0x9   :  { %2786 = vmatpush3.msra.mxu1 %v1883_v12  ;;  %2752 = vmatprep.subr.mxu0 %v1848_v16  ;;  %v1872_v43 = vunpack.c.h.bf16 %v2576_v37  ;;  %v1903_v47 = vunpack.c.l.bf16 %v2584_v33  ;;  %v1807_v50 = vunpack.c.l.bf16 %v2560_v36  ;;  %v1871_v51 = vunpack.c.l.bf16 %v2576_v37  ;;  %v3261_v61 = vld [vmem:[%s3810_s0] sm:$0xff]  ;;  %v2565_v11 = vld [vmem:[%s3809_s1 + $0x48] sm:$0xff]  }
   0xa   :  { %2787 = vmatprep.subr.mxu1 %v1912_v17  ;;  %2753 = vmatpush3.msra.mxu0 %v1816_v18  ;;  %v1836_v55 = vunpack.c.h.bf16 %v2567_v44  ;;  %v1900_v56 = vunpack.c.h.bf16 %v2583_v45  ;;  %v1804_v57 = vunpack.c.h.bf16 %v2559_v48  ;;  %v1868_v58 = vunpack.c.h.bf16 %v2575_v49  ;;  %v2581_v12 = vld [vmem:[%s3809_s1 + $0xc8] sm:$0xff]   ;;  %v2564_v25 = vld [vmem:[%s3809_s1 + $0x40] sm:$0xff]  }
   0xb   :  { %2788 = vmatpush3.msra.mxu1 %v1880_v19  ;;  %2754 = vmatprep.subr.mxu0 %v1847_v22  ;;  %v1835_v62 = vunpack.c.l.bf16 %v2567_v44  ;;  %v1899_v63 = vunpack.c.l.bf16 %v2583_v45  ;;  %v1803_v2 = vunpack.c.l.bf16 %v2559_v48  ;;  %v1867_v3 = vunpack.c.l.bf16 %v2575_v49  ;;  %v2557_v15 = vld [vmem:[%s3809_s1 + $0x8] sm:$0xff]   ;;  %v2619_v44 = vld [vmem:[%s3809_s1 + $0x1f8] sm:$0xff]  }
   0xc   :  { %2789 = vmatprep.subr.mxu1 %v1911_v23  ;;  %2755 = vmatpush3.msra.mxu0 %v1815_v26  ;;  %v806_v4 = vunpack.c.0.s8 %v805_v53  ;;  %v808_v5 = vshrl.u32 %v807_v54, 7  ;;  %v1832_v6 = vunpack.c.h.bf16 %v2566_v59  ;;  %v1896_v7 = vunpack.c.h.bf16 %v2582_v60  ;;  %v2573_v16 = vld [vmem:[%s3809_s1 + $0x88] sm:$0xff]   ;;  %v2580_v26 = vld [vmem:[%s3809_s1 + $0xc0] sm:$0xff]   ;;  %v2611_v48 = vld [vmem:[%s3809_s1 + $0x1b8] sm:$0xff]  }
   0xd   :  { %2790 = vmatpush3.msra.mxu1 %v1879_v27  ;;  %2756 = vmatprep.subr.mxu0 %v1844_v28  ;;  %v23_v8 = vunpack.c.l.bf16 %v3261_v61  ;;  %v1800_v9 = vunpack.c.h.bf16 %v2558_v0  ;;  %v1864_v10 = vunpack.c.h.bf16 %v2574_v1  ;;  %v1831_v13 = vunpack.c.l.bf16 %v2566_v59  ;;  %v2602_v53 = vld [vmem:[%s3809_s1 + $0x170] sm:$0xff]  }
   0xe   :  { %2791 = vmatprep.subr.mxu1 %v1908_v29  ;;  %2757 = vmatpush3.msra.mxu0 %v1812_v30  ;;  %v1895_v14 = vunpack.c.l.bf16 %v2582_v60  ;;  %v1799_v17 = vunpack.c.l.bf16 %v2558_v0  ;;  %v1863_v18 = vunpack.c.l.bf16 %v2574_v1  ;;  %v3282_v19 = vsub.s32 %v806_v4, %v808_v5  ;;  %v1790_v29 = vld [vmem:[%s3809_s1] sm:$0xff]   ;;  %v2618_v54 = vld [vmem:[%s3809_s1 + $0x1f0] sm:$0xff]  }
   0xf   :  { %2792 = vmatpush3.msra.mxu1 %v1876_v31  ;;  %2758 = vmatprep.subr.mxu0 %v1843_v34  ;;  %v1828_v20 = vunpack.c.h.bf16 %v2565_v11  ;;  %v1892_v21 = vunpack.c.h.bf16 %v2581_v12  ;;  %v803_v22 = vcombine.high %v23_v8, %v23_v8  ;;  %v1796_v23 = vunpack.c.h.bf16 %v2557_v15  ;;  %v2572_v30 = vld [vmem:[%s3809_s1 + $0x80] sm:$0xff]  }
  0x10   :  { %2793 = vmatprep.subr.mxu1 %v1907_v35  ;;  %2759 = vmatpush3.msra.mxu0 %v1811_v38  ;;  %v1860_v24 = vunpack.c.h.bf16 %v2573_v16  ;;  %v1827_v27 = vunpack.c.l.bf16 %v2565_v11  ;;  %v1891_v28 = vunpack.c.l.bf16 %v2581_v12  ;;  %v1795_v31 = vunpack.c.l.bf16 %v2557_v15  ;;  %v2616_v15 = vld [vmem:[%s3809_s1 + $0x1e0] sm:$0xff]  }
  0x11   :  { %2794 = vmatpush3.msra.mxu1 %v1875_v39  ;;  %2760 = vmatprep.subr.mxu0 %v1840_v40  ;;  %v1859_v32 = vunpack.c.l.bf16 %v2573_v16  ;;  %v810_v33 = vrot.slane %v23_v8, %v3282_v19  ;;  %v1824_v34 = vunpack.c.h.bf16 %v2564_v25  ;;  %v1888_v35 = vunpack.c.h.bf16 %v2580_v26 }
  0x12   :  { %2795 = vmatprep.subr.mxu1 %v1904_v41  ;;  %2761 = vmatpush3.msra.mxu0 %v1808_v42  ;;  %v817_v36 = vrot.slane %v803_v22, %v3282_v19  ;;  %v1792_v37 = vunpack.c.h.bf16 %v1790_v29  ;;  %v1856_v38 = vunpack.c.h.bf16 %v2572_v30  ;;  %v1823_v39 = vunpack.c.l.bf16 %v2564_v25 }
  0x13   :  { %2796 = vmatpush3.msra.mxu1 %v1872_v43  ;;  %2762 = vmatprep.subr.mxu0 %v1839_v46  ;;  %v1887_v40 = vunpack.c.l.bf16 %v2580_v26  ;;  %v1791_v41 = vunpack.c.l.bf16 %v1790_v29  ;;  %v818_v42 = vcombine.high %v810_v33, %v810_v33  ;;  %v2603_v43 = vld [vmem:[%s3809_s1 + $0x178] sm:$0xff]   ;;  %v1855_v45 = vunpack.c.l.bf16 %v2572_v30 }
  0x14   :  { %2797 = vmatprep.subr.mxu1 %v1903_v47  ;;  %2763 = vmatpush3.msra.mxu0 %v1807_v50  ;;  %v819_v46 = vcombine.high %v817_v36, %v817_v36  ;;  %v2595_v47 = vld [vmem:[%s3809_s1 + $0x138] sm:$0xff]   ;;  %v1980_v49 = vunpack.c.h.bf16 %v2603_v43  ;;  %v2044_v50 = vunpack.c.h.bf16 %v2619_v44  ;;  %v2012_v52 = vunpack.c.h.bf16 %v2611_v48 }
  0x15   :  { %2798 = vmatpush3.msra.mxu1 %v1871_v51  ;;  %2764 = vmatprep.subr.mxu0 %v1836_v55  ;;  %v1948_v51 = vunpack.c.h.bf16 %v2595_v47  ;;  %v1979_v55 = vunpack.c.l.bf16 %v2603_v43  ;;  %v1947_v59 = vunpack.c.l.bf16 %v2595_v47  ;;  %v2011_v60 = vunpack.c.l.bf16 %v2611_v48  ;;  %v2590_v43 = vld [vmem:[%s3809_s1 + $0x110] sm:$0xff]  }
  0x16   :  { %2799 = vmatprep.subr.mxu1 %v1900_v56  ;;  %2765 = vmatpush3.msra.mxu0 %v1804_v57  ;;  %v2043_v56 = vunpack.c.l.bf16 %v2619_v44  ;;  %v2594_v57 = vld [vmem:[%s3809_s1 + $0x130] sm:$0xff]   ;;  %v1975_v4 = vunpack.c.l.bf16 %v2602_v53  ;;  %v2039_v5 = vunpack.c.l.bf16 %v2618_v54  ;;  %v2031_v30 = vunpack.c.l.bf16 %v2616_v15 }
  0x17   :  { %2800 = vmatpush3.msra.mxu1 %v1868_v58  ;;  %2766 = vmatprep.subr.mxu0 %v1835_v62  ;;  %v2610_v58 = vld [vmem:[%s3809_s1 + $0x1b0] sm:$0xff]   ;;  %v1976_v62 = vunpack.c.h.bf16 %v2602_v53  ;;  %v1944_v0 = vunpack.c.h.bf16 %v2594_v57  ;;  %v1943_v8 = vunpack.c.l.bf16 %v2594_v57  ;;  %v2613_v53 = vld [vmem:[%s3809_s1 + $0x1c8] sm:$0xff]   ;;  %v1927_v57 = vunpack.c.l.bf16 %v2590_v43 }
  0x18   :  { %2801 = vmatprep.subr.mxu1 %v1899_v63  ;;  %2767 = vmatpush3.msra.mxu0 %v1803_v2  ;;  %v2040_v63 = vunpack.c.h.bf16 %v2618_v54  ;;  %v2008_v1 = vunpack.c.h.bf16 %v2610_v58  ;;  %v2601_v2 = vld [vmem:[%s3809_s1 + $0x168] sm:$0xff]   ;;  %v2606_v44 = vld [vmem:[%s3809_s1 + $0x190] sm:$0xff]  }
  0x19   :  { %2802 = vmatpush3.msra.mxu1 %v1867_v3  ;;  %2768 = vmatprep.subr.mxu0 %v1832_v6  ;;  %v2617_v3 = vld [vmem:[%s3809_s1 + $0x1e8] sm:$0xff]   ;;  %v1971_v16 = vunpack.c.l.bf16 %v2601_v2 }
  0x1a   :  { %2803 = vmatprep.subr.mxu1 %v1896_v7  ;;  %2769 = vmatpush3.msra.mxu0 %v1800_v9  ;;  %v2593_v6 = vld [vmem:[%s3809_s1 + $0x128] sm:$0xff]   ;;  %v2007_v9 = vunpack.c.l.bf16 %v2610_v58  ;;  %v2036_v11 = vunpack.c.h.bf16 %v2617_v3  ;;  %v1991_v58 = vunpack.c.l.bf16 %v2606_v44 }
  0x1b   :  { %2804 = vmatpush3.msra.mxu1 %v1864_v10  ;;  %2770 = vmatprep.subr.mxu0 %v1831_v13  ;;  %v2609_v7 = vld [vmem:[%s3809_s1 + $0x1a8] sm:$0xff]   ;;  %v1972_v10 = vunpack.c.h.bf16 %v2601_v2  ;;  %v1940_v12 = vunpack.c.h.bf16 %v2593_v6 }
  0x1c   :  { %2805 = vmatprep.subr.mxu1 %v1895_v14  ;;  %2771 = vmatpush3.msra.mxu0 %v1799_v17  ;;  %v2004_v13 = vunpack.c.h.bf16 %v2609_v7  ;;  %v2600_v14 = vld [vmem:[%s3809_s1 + $0x160] sm:$0xff]   ;;  %v2035_v17 = vunpack.c.l.bf16 %v2617_v3  ;;  %v2003_v22 = vunpack.c.l.bf16 %v2609_v7 }
  0x1d   :  { %2806 = vmatpush3.msra.mxu1 %v1863_v18  ;;  %2772 = vmatprep.subr.mxu0 %v1828_v20  ;;  %v2592_v18 = vld [vmem:[%s3809_s1 + $0x120] sm:$0xff]   ;;  %v1967_v29 = vunpack.c.l.bf16 %v2600_v14 }
  0x1e   :  { %2807 = vmatprep.subr.mxu1 %v1892_v21  ;;  %2773 = vmatpush3.msra.mxu0 %v1796_v23  ;;  %v2608_v20 = vld [vmem:[%s3809_s1 + $0x1a0] sm:$0xff]   ;;  %v1939_v21 = vunpack.c.l.bf16 %v2593_v6  ;;  %v1968_v23 = vunpack.c.h.bf16 %v2600_v14  ;;  %v1936_v25 = vunpack.c.h.bf16 %v2592_v18 }
  0x1f   :  { %2808 = vmatpush3.msra.mxu1 %v1860_v24  ;;  %2774 = vmatprep.subr.mxu0 %v1827_v27  ;;  %v2032_v24 = vunpack.c.h.bf16 %v2616_v15  ;;  %v2000_v26 = vunpack.c.h.bf16 %v2608_v20  ;;  %v2599_v27 = vld [vmem:[%s3809_s1 + $0x158] sm:$0xff]   ;;  %v2604_v6 = vld [vmem:[%s3809_s1 + $0x180] sm:$0xff]  }
  0x20   :  { %2809 = vmatprep.subr.mxu1 %v1891_v28  ;;  %2775 = vmatpush3.msra.mxu0 %v1795_v31  ;;  %v2615_v28 = vld [vmem:[%s3809_s1 + $0x1d8] sm:$0xff]  }
  0x21   :  { %2810 = vmatpush3.msra.mxu1 %v1859_v32  ;;  %2776 = vmatprep.subr.mxu0 %v1824_v34  ;;  %v2591_v31 = vld [vmem:[%s3809_s1 + $0x118] sm:$0xff]   ;;  %v1999_v34 = vunpack.c.l.bf16 %v2608_v20 }
  0x22   :  { %2811 = vmatprep.subr.mxu1 %v1888_v35  ;;  %2777 = vmatpush3.msra.mxu0 %v1792_v37  ;;  %v2607_v32 = vld [vmem:[%s3809_s1 + $0x198] sm:$0xff]   ;;  %v1964_v35 = vunpack.c.h.bf16 %v2599_v27  ;;  %v1932_v37 = vunpack.c.h.bf16 %v2591_v31 }
  0x23   :  { %2812 = vmatpush3.msra.mxu1 %v1856_v38  ;;  %2778 = vmatprep.subr.mxu0 %v1823_v39  ;;  %v1996_v38 = vunpack.c.h.bf16 %v2607_v32  ;;  %v2598_v39 = vld [vmem:[%s3809_s1 + $0x150] sm:$0xff]  }
  0x24   :  { %2813 = vmatprep.subr.mxu1 %v1887_v40  ;;  %2779 = vmatpush3.msra.mxu0 %v1791_v41  ;;  %v2614_v40 = vld [vmem:[%s3809_s1 + $0x1d0] sm:$0xff]   ;;  %v1963_v41 = vunpack.c.l.bf16 %v2599_v27  ;;  %v1960_v47 = vunpack.c.h.bf16 %v2598_v39  ;;  %v1959_v54 = vunpack.c.l.bf16 %v2598_v39 }
  0x25   :  { %993 = vmatprep.mubr.f32.mxu0 %v818_v42  ;;  %2814 = vmatpush3.msra.mxu1 %v1855_v45  ;;  %v2027_v42 = vunpack.c.l.bf16 %v2615_v28  ;;  %v1931_v45 = vunpack.c.l.bf16 %v2591_v31  ;;  %v2024_v48 = vunpack.c.h.bf16 %v2614_v40  ;;  %v2650_v31 = vld [vmem:[%s3809_s1 + $0x2f0] sm:$0xff]  }
  0x26   :  { %1063 = vmatprep.mubr.f32.mxu1 %v819_v46  ;;  %994 = vmatmul.mubr.f32.vlgmr.msra.gmra.mxu0 %v810_v33  ;;  %v1935_v33 = vunpack.c.l.bf16 %v2592_v18  ;;  %v1995_v46 = vunpack.c.l.bf16 %v2607_v32  ;;  %v2168_v39 = vunpack.c.h.bf16 %v2650_v31 }
  0x27   :  { %1064 = vmatmul.mubr.f32.vlgmr.msra.gmra.mxu1 %v817_v36  ;;  %2818 = vmatprep.subr.mxu0 %v1980_v49  ;;  %v2028_v36 = vunpack.c.h.bf16 %v2615_v28  ;;  %v24_v49 = vunpack.c.h.bf16 %v3261_v61  ;;  %v2589_v61 = vld [vmem:[%s3809_s1 + $0x108] sm:$0xff]  }
  0x28   :  { %2853 = vmatprep.subr.mxu1 %v2044_v50  ;;  %2819 = vmatpush3.msra.mxu0 %v1948_v51  ;;  %v1928_v50 = vunpack.c.h.bf16 %v2590_v43  ;;  %v1992_v51 = vunpack.c.h.bf16 %v2606_v44  ;;  %v1923_v7 = vunpack.c.l.bf16 %v2589_v61  ;;  %v2649_v43 = vld [vmem:[%s3809_s1 + $0x2e8] sm:$0xff]  }
  0x29   :  { %2854 = vmatpush3.msra.mxu1 %v2012_v52  ;;  %2820 = vmatprep.subr.mxu0 %v1979_v55  ;;  %v2597_v52 = vld [vmem:[%s3809_s1 + $0x148] sm:$0xff]   ;;  %v2023_v55 = vunpack.c.l.bf16 %v2614_v40  ;;  %v820_v2 = vcombine.high %v24_v49, %v24_v49 }
  0x2a   :  { %2855 = vmatprep.subr.mxu1 %v2043_v56  ;;  %2821 = vmatpush3.msra.mxu0 %v1947_v59  ;;  %v2605_v56 = vld [vmem:[%s3809_s1 + $0x188] sm:$0xff]   ;;  %v1956_v59 = vunpack.c.h.bf16 %v2597_v52  ;;  %v1955_v3 = vunpack.c.l.bf16 %v2597_v52 }
  0x2b   :  { %2856 = vmatpush3.msra.mxu1 %v2011_v60  ;;  %2822 = vmatprep.subr.mxu0 %v1976_v62  ;;  %v2020_v60 = vunpack.c.h.bf16 %v2613_v53  ;;  %v1924_v62 = vunpack.c.h.bf16 %v2589_v61  ;;  %v834_v14 = vrot.slane %v820_v2, %v3282_v19  ;;  %v2631_v2 = vld [vmem:[%s3809_s1 + $0x258] sm:$0xff]  }
  0x2c   :  { %2857 = vmatprep.subr.mxu1 %v2040_v63  ;;  %2823 = vmatpush3.msra.mxu0 %v1944_v0  ;;  %v1988_v63 = vunpack.c.h.bf16 %v2605_v56  ;;  %v2596_v0 = vld [vmem:[%s3809_s1 + $0x140] sm:$0xff]  }
  0x2d   :  { %2858 = vmatpush3.msra.mxu1 %v2008_v1  ;;  %2824 = vmatprep.subr.mxu0 %v1975_v4  ;;  %v2612_v1 = vld [vmem:[%s3809_s1 + $0x1c0] sm:$0xff]   ;;  %v2019_v4 = vunpack.c.l.bf16 %v2613_v53  ;;  %v1951_v15 = vunpack.c.l.bf16 %v2596_v0 }
  0x2e   :  { %2859 = vmatprep.subr.mxu1 %v2039_v5  ;;  %2825 = vmatpush3.msra.mxu0 %v1943_v8  ;;  %v2588_v5 = vld [vmem:[%s3809_s1 + $0x100] sm:$0xff]   ;;  %v1987_v8 = vunpack.c.l.bf16 %v2605_v56  ;;  %v2163_v56 = vunpack.c.l.bf16 %v2649_v43 }
  0x2f   :  { %2860 = vmatpush3.msra.mxu1 %v2007_v9  ;;  %2826 = vmatprep.subr.mxu0 %v1972_v10  ;;  %v827_v9 = vrot.slane %v24_v49, %v3282_v19  ;;  %v1952_v10 = vunpack.c.h.bf16 %v2596_v0  ;;  %v1919_v18 = vunpack.c.l.bf16 %v2588_v5 }
  0x30   :  { %2861 = vmatprep.subr.mxu1 %v2036_v11  ;;  %2827 = vmatpush3.msra.mxu0 %v1940_v12  ;;  %v2016_v11 = vunpack.c.h.bf16 %v2612_v1  ;;  %v1920_v12 = vunpack.c.h.bf16 %v2588_v5 }
  0x31   :  { %2862 = vmatpush3.msra.mxu1 %v2004_v13  ;;  %2828 = vmatprep.subr.mxu0 %v1971_v16  ;;  %v1984_v13 = vunpack.c.h.bf16 %v2604_v6  ;;  %v2015_v16 = vunpack.c.l.bf16 %v2612_v1  ;;  %v835_v20 = vcombine.high %v827_v9, %v827_v9 }
  0x32   :  { %2863 = vmatprep.subr.mxu1 %v2035_v17  ;;  %2829 = vmatpush3.msra.mxu0 %v1939_v21  ;;  %v2635_v17 = vld [vmem:[%s3809_s1 + $0x278] sm:$0xff]  }
  0x33   :  { %2864 = vmatpush3.msra.mxu1 %v2003_v22  ;;  %2830 = vmatprep.subr.mxu0 %v1968_v23  ;;  %v2651_v21 = vld [vmem:[%s3809_s1 + $0x2f8] sm:$0xff]   ;;  %v1983_v22 = vunpack.c.l.bf16 %v2604_v6  ;;  %v2107_v32 = vunpack.c.l.bf16 %v2635_v17 }
  0x34   :  { %2865 = vmatprep.subr.mxu1 %v2032_v24  ;;  %2831 = vmatpush3.msra.mxu0 %v1936_v25  ;;  %v2627_v23 = vld [vmem:[%s3809_s1 + $0x238] sm:$0xff]   ;;  %v836_v25 = vcombine.high %v834_v14, %v834_v14  ;;  %v2172_v27 = vunpack.c.h.bf16 %v2651_v21 }
  0x35   :  { %2866 = vmatpush3.msra.mxu1 %v2000_v26  ;;  %2832 = vmatprep.subr.mxu0 %v1967_v29  ;;  %v2643_v24 = vld [vmem:[%s3809_s1 + $0x2b8] sm:$0xff]   ;;  %v2108_v26 = vunpack.c.h.bf16 %v2635_v17  ;;  %v2076_v28 = vunpack.c.h.bf16 %v2627_v23 }
  0x36   :  { %2867 = vmatprep.subr.mxu1 %v2031_v30  ;;  %2833 = vmatpush3.msra.mxu0 %v1935_v33  ;;  %v2140_v29 = vunpack.c.h.bf16 %v2643_v24  ;;  %v2634_v30 = vld [vmem:[%s3809_s1 + $0x270] sm:$0xff]   ;;  %v2171_v33 = vunpack.c.l.bf16 %v2651_v21  ;;  %v2623_v6 = vld [vmem:[%s3809_s1 + $0x218] sm:$0xff]   ;;  %v3472_v21 = vld [vmem:[%s3810_s0 + $0x8] sm:$0xff] }
  0x37   :  { %2868 = vmatpush3.msra.mxu1 %v1999_v34  ;;  %2834 = vmatprep.subr.mxu0 %v1964_v35  ;;  %v2626_v34 = vld [vmem:[%s3809_s1 + $0x230] sm:$0xff]   ;;  %v2103_v44 = vunpack.c.l.bf16 %v2634_v30 }
  0x38   :  { %2869 = vmatprep.subr.mxu1 %v2028_v36  ;;  %2835 = vmatpush3.msra.mxu0 %v1932_v37  ;;  %v2642_v35 = vld [vmem:[%s3809_s1 + $0x2b0] sm:$0xff]   ;;  %v2075_v36 = vunpack.c.l.bf16 %v2627_v23  ;;  %v2139_v37 = vunpack.c.l.bf16 %v2643_v24  ;;  %v2072_v40 = vunpack.c.h.bf16 %v2626_v34 }
  0x39   :  { %2870 = vmatpush3.msra.mxu1 %v1996_v38  ;;  %2836 = vmatprep.subr.mxu0 %v1963_v41  ;;  %v2104_v38 = vunpack.c.h.bf16 %v2634_v30  ;;  %v2136_v41 = vunpack.c.h.bf16 %v2642_v35  ;;  %v2135_v49 = vunpack.c.l.bf16 %v2642_v35  ;;  %v25_v30 = vunpack.c.l.bf16 %v3472_v21 }
  0x3a   :  { %2871 = vmatprep.subr.mxu1 %v2027_v42  ;;  %2837 = vmatpush3.msra.mxu0 %v1931_v45  ;;  %v2633_v42 = vld [vmem:[%s3809_s1 + $0x268] sm:$0xff]   ;;  %v2167_v45 = vunpack.c.l.bf16 %v2650_v31 }
  0x3b   :  { %2872 = vmatpush3.msra.mxu1 %v1995_v46  ;;  %2838 = vmatprep.subr.mxu0 %v1960_v47  ;;  %v2625_v46 = vld [vmem:[%s3809_s1 + $0x228] sm:$0xff]   ;;  %v2099_v61 = vunpack.c.l.bf16 %v2633_v42 }
  0x3c   :  { %2873 = vmatprep.subr.mxu1 %v2024_v48  ;;  %2839 = vmatpush3.msra.mxu0 %v1928_v50  ;;  %v2641_v47 = vld [vmem:[%s3809_s1 + $0x2a8] sm:$0xff]   ;;  %v2071_v48 = vunpack.c.l.bf16 %v2626_v34  ;;  %v2100_v50 = vunpack.c.h.bf16 %v2633_v42  ;;  %v2068_v52 = vunpack.c.h.bf16 %v2625_v46  ;;  %v2644_v42 = vld [vmem:[%s3809_s1 + $0x2c0] sm:$0xff]  }
  0x3d   :  { %2874 = vmatpush3.msra.mxu1 %v1992_v51  ;;  %2840 = vmatprep.subr.mxu0 %v1959_v54  ;;  %v2164_v51 = vunpack.c.h.bf16 %v2649_v43  ;;  %v2132_v53 = vunpack.c.h.bf16 %v2641_v47  ;;  %v2632_v54 = vld [vmem:[%s3809_s1 + $0x260] sm:$0xff]   ;;  %v2637_v34 = vld [vmem:[%s3809_s1 + $0x288] sm:$0xff]   ;;  %v837_v43 = vcombine.high %v25_v30, %v25_v30 }
  0x3e   :  { %2875 = vmatprep.subr.mxu1 %v2023_v55  ;;  %2841 = vmatpush3.msra.mxu0 %v1927_v57  ;;  %v2648_v55 = vld [vmem:[%s3809_s1 + $0x2e0] sm:$0xff]  }
  0x3f   :  { %2876 = vmatpush3.msra.mxu1 %v1991_v58  ;;  %2842 = vmatprep.subr.mxu0 %v1956_v59  ;;  %v2624_v57 = vld [vmem:[%s3809_s1 + $0x220] sm:$0xff]   ;;  %v2067_v59 = vunpack.c.l.bf16 %v2625_v46  ;;  %v2159_v5 = vunpack.c.l.bf16 %v2648_v55 }
  0x40   :  { %2877 = vmatprep.subr.mxu1 %v2020_v60  ;;  %2843 = vmatpush3.msra.mxu0 %v1924_v62  ;;  %v2640_v58 = vld [vmem:[%s3809_s1 + $0x2a0] sm:$0xff]   ;;  %v2131_v60 = vunpack.c.l.bf16 %v2641_v47  ;;  %v2096_v62 = vunpack.c.h.bf16 %v2632_v54  ;;  %v2064_v0 = vunpack.c.h.bf16 %v2624_v57 }
  0x41   :  { %2878 = vmatpush3.msra.mxu1 %v1988_v63  ;;  %2844 = vmatprep.subr.mxu0 %v1955_v3  ;;  %v2160_v63 = vunpack.c.h.bf16 %v2648_v55  ;;  %v2128_v1 = vunpack.c.h.bf16 %v2640_v58  ;;  %v2647_v3 = vld [vmem:[%s3809_s1 + $0x2d8] sm:$0xff]   ;;  %v2620_v46 = vld [vmem:[%s3809_s1 + $0x200] sm:$0xff]   ;;  %v851_v55 = vrot.slane %v837_v43, %v3282_v19 }
  0x42   :  { %2879 = vmatprep.subr.mxu1 %v2019_v4  ;;  %2845 = vmatpush3.msra.mxu0 %v1923_v7  ;;  %v2095_v4 = vunpack.c.l.bf16 %v2632_v54  ;;  %v2639_v7 = vld [vmem:[%s3809_s1 + $0x298] sm:$0xff]   ;;  %v2155_v17 = vunpack.c.l.bf16 %v2647_v3  ;;  %v2636_v47 = vld [vmem:[%s3809_s1 + $0x280] sm:$0xff]  }
  0x43   :  { %2880 = vmatpush3.msra.mxu1 %v1987_v8  ;;  %2846 = vmatprep.subr.mxu0 %v1952_v10  ;;  %v2063_v8 = vunpack.c.l.bf16 %v2624_v57  ;;  %v2092_v10 = vunpack.c.h.bf16 %v2631_v2  ;;  %v2123_v23 = vunpack.c.l.bf16 %v2639_v7  ;;  %v2112_v54 = vunpack.c.h.bf16 %v2636_v47  ;;  %v2667_v57 = vld [vmem:[%s3809_s1 + $0x378] sm:$0xff]  }
  0x44   :  { %2881 = vmatprep.subr.mxu1 %v2016_v11  ;;  %2847 = vmatpush3.msra.mxu0 %v1920_v12  ;;  %v2156_v11 = vunpack.c.h.bf16 %v2647_v3  ;;  %v2060_v12 = vunpack.c.h.bf16 %v2623_v6 }
  0x45   :  { %2882 = vmatpush3.msra.mxu1 %v1984_v13  ;;  %2848 = vmatprep.subr.mxu0 %v1951_v15  ;;  %v2124_v13 = vunpack.c.h.bf16 %v2639_v7  ;;  %v2646_v15 = vld [vmem:[%s3809_s1 + $0x2d0] sm:$0xff]  }
  0x46   :  { %2883 = vmatprep.subr.mxu1 %v2015_v16  ;;  %2849 = vmatpush3.msra.mxu0 %v1919_v18  ;;  %v2091_v16 = vunpack.c.l.bf16 %v2631_v2  ;;  %v2622_v18 = vld [vmem:[%s3809_s1 + $0x210] sm:$0xff]   ;;  %v2236_v2 = vunpack.c.h.bf16 %v2667_v57 }
  0x47   :  { %1133 = vmatprep.mubr.f32.mxu0 %v835_v20  ;;  %2884 = vmatpush3.msra.mxu1 %v1983_v22  ;;  %v2638_v20 = vld [vmem:[%s3809_s1 + $0x290] sm:$0xff]   ;;  %v2059_v22 = vunpack.c.l.bf16 %v2623_v6  ;;  %v2055_v35 = vunpack.c.l.bf16 %v2622_v18 }
  0x48   :  { %1134 = vmatmul.mubr.f32.vlgmr.msra.gmra.mxu0 %v827_v9  ;;  %1203 = vmatprep.mubr.f32.mxu1 %v836_v25  ;;  %v2127_v9 = vunpack.c.l.bf16 %v2640_v58  ;;  %v2152_v25 = vunpack.c.h.bf16 %v2646_v15  ;;  %v2047_v58 = vunpack.c.l.bf16 %v2620_v46  ;;  %v2666_v6 = vld [vmem:[%s3809_s1 + $0x370] sm:$0xff]  }
  0x49   :  { %2888 = vmatprep.subr.mxu0 %v2108_v26  ;;  %2923 = vmatprep.subr.mxu1 %v2172_v27  ;;  %v2056_v26 = vunpack.c.h.bf16 %v2622_v18  ;;  %v2120_v27 = vunpack.c.h.bf16 %v2638_v20  ;;  %v2682_v7 = vld [vmem:[%s3809_s1 + $0x3f0] sm:$0xff]   ;;  %v2665_v18 = vld [vmem:[%s3809_s1 + $0x368] sm:$0xff]  }
  0x4a   :  { %1204 = vmatmul.mubr.f32.vlgmr.msra.gmra.mxu1 %v834_v14  ;;  %2889 = vmatpush3.msra.mxu0 %v2076_v28  ;;  %v2630_v14 = vld [vmem:[%s3809_s1 + $0x250] sm:$0xff]   ;;  %v2629_v28 = vld [vmem:[%s3809_s1 + $0x248] sm:$0xff]  }
  0x4b   :  { %2924 = vmatpush3.msra.mxu1 %v2140_v29  ;;  %2890 = vmatprep.subr.mxu0 %v2107_v32  ;;  %v2088_v24 = vunpack.c.h.bf16 %v2630_v14  ;;  %v2645_v29 = vld [vmem:[%s3809_s1 + $0x2c8] sm:$0xff]   ;;  %v2087_v31 = vunpack.c.l.bf16 %v2630_v14  ;;  %v2151_v32 = vunpack.c.l.bf16 %v2646_v15  ;;  %v2232_v14 = vunpack.c.h.bf16 %v2666_v6 }
  0x4c   :  { %2925 = vmatprep.subr.mxu1 %v2171_v33  ;;  %2891 = vmatpush3.msra.mxu0 %v2075_v36  ;;  %v2621_v33 = vld [vmem:[%s3809_s1 + $0x208] sm:$0xff]   ;;  %v2119_v36 = vunpack.c.l.bf16 %v2638_v20  ;;  %v2296_v15 = vunpack.c.h.bf16 %v2682_v7 }
  0x4d   :  { %2926 = vmatpush3.msra.mxu1 %v2139_v37  ;;  %2892 = vmatprep.subr.mxu0 %v2104_v38  ;;  %v2084_v37 = vunpack.c.h.bf16 %v2629_v28  ;;  %v2148_v38 = vunpack.c.h.bf16 %v2645_v29  ;;  %v2681_v20 = vld [vmem:[%s3809_s1 + $0x3e8] sm:$0xff]  }
  0x4e   :  { %2927 = vmatprep.subr.mxu1 %v2168_v39  ;;  %2893 = vmatpush3.msra.mxu0 %v2072_v40  ;;  %v2052_v39 = vunpack.c.h.bf16 %v2621_v33  ;;  %v2116_v40 = vunpack.c.h.bf16 %v2637_v34 }
  0x4f   :  { %2928 = vmatpush3.msra.mxu1 %v2136_v41  ;;  %2894 = vmatprep.subr.mxu0 %v2103_v44  ;;  %v2628_v41 = vld [vmem:[%s3809_s1 + $0x240] sm:$0xff]   ;;  %v2083_v44 = vunpack.c.l.bf16 %v2629_v28  ;;  %v2228_v28 = vunpack.c.h.bf16 %v2665_v18 }
  0x50   :  { %2929 = vmatprep.subr.mxu1 %v2167_v45  ;;  %2895 = vmatpush3.msra.mxu0 %v2071_v48  ;;  %v2147_v45 = vunpack.c.l.bf16 %v2645_v29  ;;  %v2051_v48 = vunpack.c.l.bf16 %v2621_v33  ;;  %v2292_v29 = vunpack.c.h.bf16 %v2681_v20  ;;  %v2680_v33 = vld [vmem:[%s3809_s1 + $0x3e0] sm:$0xff]  }
  0x51   :  { %2930 = vmatpush3.msra.mxu1 %v2135_v49  ;;  %2896 = vmatprep.subr.mxu0 %v2100_v50  ;;  %v2115_v49 = vunpack.c.l.bf16 %v2637_v34  ;;  %v844_v50 = vrot.slane %v25_v30, %v3282_v19  ;;  %v2227_v34 = vunpack.c.l.bf16 %v2665_v18 }
  0x52   :  { %2931 = vmatprep.subr.mxu1 %v2164_v51  ;;  %2897 = vmatpush3.msra.mxu0 %v2068_v52  ;;  %v2080_v51 = vunpack.c.h.bf16 %v2628_v41  ;;  %v2144_v52 = vunpack.c.h.bf16 %v2644_v42 }
  0x53   :  { %2932 = vmatpush3.msra.mxu1 %v2132_v53  ;;  %2898 = vmatprep.subr.mxu0 %v2099_v61  ;;  %v2048_v53 = vunpack.c.h.bf16 %v2620_v46  ;;  %v2079_v61 = vunpack.c.l.bf16 %v2628_v41  ;;  %v2288_v41 = vunpack.c.h.bf16 %v2680_v33 }
  0x54   :  { %2933 = vmatprep.subr.mxu1 %v2163_v56  ;;  %2899 = vmatpush3.msra.mxu0 %v2067_v59  ;;  %v2143_v56 = vunpack.c.l.bf16 %v2644_v42  ;;  %v852_v59 = vcombine.high %v844_v50, %v844_v50 }
  0x55   :  { %2934 = vmatpush3.msra.mxu1 %v2131_v60  ;;  %2900 = vmatprep.subr.mxu0 %v2096_v62  ;;  %v2683_v60 = vld [vmem:[%s3809_s1 + $0x3f8] sm:$0xff]   ;;  %v2111_v62 = vunpack.c.l.bf16 %v2636_v47  ;;  %v2287_v47 = vunpack.c.l.bf16 %v2680_v33 }
  0x56   :  { %2935 = vmatprep.subr.mxu1 %v2160_v63  ;;  %2901 = vmatpush3.msra.mxu0 %v2064_v0  ;;  %v2659_v63 = vld [vmem:[%s3809_s1 + $0x338] sm:$0xff]   ;;  %v2300_v3 = vunpack.c.h.bf16 %v2683_v60 }
  0x57   :  { %2936 = vmatpush3.msra.mxu1 %v2128_v1  ;;  %2902 = vmatprep.subr.mxu0 %v2095_v4  ;;  %v2675_v0 = vld [vmem:[%s3809_s1 + $0x3b8] sm:$0xff]   ;;  %v853_v1 = vcombine.high %v851_v55, %v851_v55  ;;  %v2204_v4 = vunpack.c.h.bf16 %v2659_v63 }
  0x58   :  { %2937 = vmatprep.subr.mxu1 %v2159_v5  ;;  %2903 = vmatpush3.msra.mxu0 %v2063_v8  ;;  %v2268_v5 = vunpack.c.h.bf16 %v2675_v0  ;;  %v2235_v8 = vunpack.c.l.bf16 %v2667_v57 }
  0x59   :  { %2938 = vmatpush3.msra.mxu1 %v2127_v9  ;;  %2904 = vmatprep.subr.mxu0 %v2092_v10  ;;  %v2299_v9 = vunpack.c.l.bf16 %v2683_v60  ;;  %v2658_v10 = vld [vmem:[%s3809_s1 + $0x330] sm:$0xff]  }
  0x5a   :  { %2939 = vmatprep.subr.mxu1 %v2156_v11  ;;  %2905 = vmatpush3.msra.mxu0 %v2060_v12  ;;  %v2674_v11 = vld [vmem:[%s3809_s1 + $0x3b0] sm:$0xff]   ;;  %v2203_v12 = vunpack.c.l.bf16 %v2659_v63 }
  0x5b   :  { %2940 = vmatpush3.msra.mxu1 %v2124_v13  ;;  %2906 = vmatprep.subr.mxu0 %v2091_v16  ;;  %v2267_v13 = vunpack.c.l.bf16 %v2675_v0  ;;  %v2200_v16 = vunpack.c.h.bf16 %v2658_v10  ;;  %v2670_v60 = vld [vmem:[%s3809_s1 + $0x390] sm:$0xff]  }
  0x5c   :  { %2941 = vmatprep.subr.mxu1 %v2155_v17  ;;  %2907 = vmatpush3.msra.mxu0 %v2059_v22  ;;  %v2264_v17 = vunpack.c.h.bf16 %v2674_v11  ;;  %v2231_v22 = vunpack.c.l.bf16 %v2666_v6  ;;  %v26_v6 = vunpack.c.h.bf16 %v3472_v21 }
  0x5d   :  { %2942 = vmatpush3.msra.mxu1 %v2123_v23  ;;  %2908 = vmatprep.subr.mxu0 %v2088_v24  ;;  %v2295_v23 = vunpack.c.l.bf16 %v2682_v7  ;;  %v2657_v24 = vld [vmem:[%s3809_s1 + $0x328] sm:$0xff]  }
  0x5e   :  { %2943 = vmatprep.subr.mxu1 %v2152_v25  ;;  %2909 = vmatpush3.msra.mxu0 %v2056_v26  ;;  %v2673_v25 = vld [vmem:[%s3809_s1 + $0x3a8] sm:$0xff]   ;;  %v2199_v26 = vunpack.c.l.bf16 %v2658_v10  ;;  %v2196_v30 = vunpack.c.h.bf16 %v2657_v24  ;;  %v854_v18 = vcombine.high %v26_v6, %v26_v6 }
  0x5f   :  { %2944 = vmatpush3.msra.mxu1 %v2120_v27  ;;  %2910 = vmatprep.subr.mxu0 %v2087_v31  ;;  %v2263_v27 = vunpack.c.l.bf16 %v2674_v11  ;;  %v2260_v31 = vunpack.c.h.bf16 %v2673_v25  ;;  %v2669_v10 = vld [vmem:[%s3809_s1 + $0x388] sm:$0xff]  }
  0x60   :  { %2945 = vmatprep.subr.mxu1 %v2151_v32  ;;  %2911 = vmatpush3.msra.mxu0 %v2055_v35  ;;  %v2664_v32 = vld [vmem:[%s3809_s1 + $0x360] sm:$0xff]   ;;  %v2291_v35 = vunpack.c.l.bf16 %v2681_v20 }
  0x61   :  { %2946 = vmatpush3.msra.mxu1 %v2119_v36  ;;  %2912 = vmatprep.subr.mxu0 %v2084_v37  ;;  %v2656_v36 = vld [vmem:[%s3809_s1 + $0x320] sm:$0xff]   ;;  %v2223_v46 = vunpack.c.l.bf16 %v2664_v32 }
  0x62   :  { %2947 = vmatprep.subr.mxu1 %v2148_v38  ;;  %2913 = vmatpush3.msra.mxu0 %v2052_v39  ;;  %v2672_v37 = vld [vmem:[%s3809_s1 + $0x3a0] sm:$0xff]   ;;  %v2195_v38 = vunpack.c.l.bf16 %v2657_v24  ;;  %v2259_v39 = vunpack.c.l.bf16 %v2673_v25  ;;  %v2192_v42 = vunpack.c.h.bf16 %v2656_v36 }
  0x63   :  { %2948 = vmatpush3.msra.mxu1 %v2116_v40  ;;  %2914 = vmatprep.subr.mxu0 %v2083_v44  ;;  %v2224_v40 = vunpack.c.h.bf16 %v2664_v32  ;;  %v2256_v43 = vunpack.c.h.bf16 %v2672_v37  ;;  %v2663_v44 = vld [vmem:[%s3809_s1 + $0x358] sm:$0xff]   ;;  %v2668_v24 = vld [vmem:[%s3809_s1 + $0x380] sm:$0xff]   ;;  %v868_v32 = vrot.slane %v854_v18, %v3282_v19 }
  0x64   :  { %2949 = vmatprep.subr.mxu1 %v2147_v45  ;;  %2915 = vmatpush3.msra.mxu0 %v2051_v48  ;;  %v2679_v45 = vld [vmem:[%s3809_s1 + $0x3d8] sm:$0xff]   ;;  %v2219_v57 = vunpack.c.l.bf16 %v2663_v44 }
  0x65   :  { %2950 = vmatpush3.msra.mxu1 %v2115_v49  ;;  %2916 = vmatprep.subr.mxu0 %v2080_v51  ;;  %v2655_v48 = vld [vmem:[%s3809_s1 + $0x318] sm:$0xff]   ;;  %v2255_v51 = vunpack.c.l.bf16 %v2672_v37 }
  0x66   :  { %2951 = vmatprep.subr.mxu1 %v2144_v52  ;;  %2917 = vmatpush3.msra.mxu0 %v2048_v53  ;;  %v2671_v49 = vld [vmem:[%s3809_s1 + $0x398] sm:$0xff]   ;;  %v2220_v52 = vunpack.c.h.bf16 %v2663_v44  ;;  %v2284_v53 = vunpack.c.h.bf16 %v2679_v45 }
  0x67   :  { %2952 = vmatpush3.msra.mxu1 %v2112_v54  ;;  %2918 = vmatprep.subr.mxu0 %v2079_v61  ;;  %v2188_v54 = vunpack.c.h.bf16 %v2655_v48  ;;  %v2662_v61 = vld [vmem:[%s3809_s1 + $0x350] sm:$0xff]   ;;  %v2251_v63 = vunpack.c.l.bf16 %v2671_v49  ;;  %v2695_v18 = vld [vmem:[%s3809_s1 + $0x458] sm:$0xff]  }
  0x68   :  { %2953 = vmatprep.subr.mxu1 %v2143_v56  ;;  %2919 = vmatpush3.msra.mxu0 %v2047_v58  ;;  %v2678_v56 = vld [vmem:[%s3809_s1 + $0x3d0] sm:$0xff]   ;;  %v2283_v58 = vunpack.c.l.bf16 %v2679_v45  ;;  %v2216_v0 = vunpack.c.h.bf16 %v2662_v61  ;;  %v2215_v7 = vunpack.c.l.bf16 %v2662_v61 }
  0x69   :  { %1273 = vmatprep.mubr.f32.mxu0 %v852_v59  ;;  %2954 = vmatpush3.msra.mxu1 %v2111_v62  ;;  %v2654_v59 = vld [vmem:[%s3809_s1 + $0x310] sm:$0xff]   ;;  %v2187_v62 = vunpack.c.l.bf16 %v2655_v48 }
  0x6a   :  { %1274 = vmatmul.mubr.f32.vlgmr.msra.gmra.mxu0 %v844_v50  ;;  %1343 = vmatprep.mubr.f32.mxu1 %v853_v1  ;;  %v2191_v50 = vunpack.c.l.bf16 %v2656_v36  ;;  %v2280_v1 = vunpack.c.h.bf16 %v2678_v56  ;;  %v2183_v11 = vunpack.c.l.bf16 %v2654_v59  ;;  %v2714_v48 = vld [vmem:[%s3809_s1 + $0x4f0] sm:$0xff]  }
  0x6b   :  { %2958 = vmatprep.subr.mxu0 %v2236_v2  ;;  %2993 = vmatprep.subr.mxu1 %v2300_v3  ;;  %v2184_v2 = vunpack.c.h.bf16 %v2654_v59  ;;  %v2248_v3 = vunpack.c.h.bf16 %v2670_v60  ;;  %v2424_v61 = vunpack.c.h.bf16 %v2714_v48  ;;  %v2713_v59 = vld [vmem:[%s3809_s1 + $0x4e8] sm:$0xff]  }
  0x6c   :  { %1344 = vmatmul.mubr.f32.vlgmr.msra.gmra.mxu1 %v851_v55  ;;  %2959 = vmatpush3.msra.mxu0 %v2204_v4  ;;  %v2252_v55 = vunpack.c.h.bf16 %v2671_v49  ;;  %v2661_v4 = vld [vmem:[%s3809_s1 + $0x348] sm:$0xff]  }
  0x6d   :  { %2994 = vmatpush3.msra.mxu1 %v2268_v5  ;;  %2960 = vmatprep.subr.mxu0 %v2235_v8  ;;  %v2677_v5 = vld [vmem:[%s3809_s1 + $0x3c8] sm:$0xff]   ;;  %v2279_v8 = vunpack.c.l.bf16 %v2678_v56  ;;  %v2211_v20 = vunpack.c.l.bf16 %v2661_v4 }
  0x6e   :  { %2995 = vmatprep.subr.mxu1 %v2299_v9  ;;  %2961 = vmatpush3.msra.mxu0 %v2203_v12  ;;  %v2653_v9 = vld [vmem:[%s3809_s1 + $0x308] sm:$0xff]   ;;  %v2247_v12 = vunpack.c.l.bf16 %v2670_v60  ;;  %v2276_v21 = vunpack.c.h.bf16 %v2677_v5 }
  0x6f   :  { %2996 = vmatpush3.msra.mxu1 %v2267_v13  ;;  %2962 = vmatprep.subr.mxu0 %v2232_v14  ;;  %v2212_v13 = vunpack.c.h.bf16 %v2661_v4  ;;  %v2180_v14 = vunpack.c.h.bf16 %v2653_v9  ;;  %v2179_v25 = vunpack.c.l.bf16 %v2653_v9  ;;  %v2420_v4 = vunpack.c.h.bf16 %v2713_v59 }
  0x70   :  { %2997 = vmatprep.subr.mxu1 %v2296_v15  ;;  %2963 = vmatpush3.msra.mxu0 %v2200_v16  ;;  %v2244_v15 = vunpack.c.h.bf16 %v2669_v10  ;;  %v2660_v16 = vld [vmem:[%s3809_s1 + $0x340] sm:$0xff]  }
  0x71   :  { %2998 = vmatpush3.msra.mxu1 %v2264_v17  ;;  %2964 = vmatprep.subr.mxu0 %v2231_v22  ;;  %v2676_v17 = vld [vmem:[%s3809_s1 + $0x3c0] sm:$0xff]   ;;  %v2275_v22 = vunpack.c.l.bf16 %v2677_v5  ;;  %v2207_v33 = vunpack.c.l.bf16 %v2660_v16 }
  0x72   :  { %2999 = vmatprep.subr.mxu1 %v2295_v23  ;;  %2965 = vmatpush3.msra.mxu0 %v2199_v26  ;;  %v2652_v23 = vld [vmem:[%s3809_s1 + $0x300] sm:$0xff]   ;;  %v2243_v26 = vunpack.c.l.bf16 %v2669_v10  ;;  %v2419_v10 = vunpack.c.l.bf16 %v2713_v59 }
  0x73   :  { %3000 = vmatpush3.msra.mxu1 %v2263_v27  ;;  %2966 = vmatprep.subr.mxu0 %v2228_v28  ;;  %v861_v27 = vrot.slane %v26_v6, %v3282_v19  ;;  %v2208_v28 = vunpack.c.h.bf16 %v2660_v16  ;;  %v2175_v36 = vunpack.c.l.bf16 %v2652_v23 }
  0x74   :  { %3001 = vmatprep.subr.mxu1 %v2292_v29  ;;  %2967 = vmatpush3.msra.mxu0 %v2196_v30  ;;  %v2272_v29 = vunpack.c.h.bf16 %v2676_v17  ;;  %v2176_v30 = vunpack.c.h.bf16 %v2652_v23 }
  0x75   :  { %3002 = vmatpush3.msra.mxu1 %v2260_v31  ;;  %2968 = vmatprep.subr.mxu0 %v2227_v34  ;;  %v2240_v31 = vunpack.c.h.bf16 %v2668_v24  ;;  %v2271_v34 = vunpack.c.l.bf16 %v2676_v17  ;;  %v869_v37 = vcombine.high %v861_v27, %v861_v27 }
  0x76   :  { %3003 = vmatprep.subr.mxu1 %v2291_v35  ;;  %2969 = vmatpush3.msra.mxu0 %v2195_v38  ;;  %v2699_v35 = vld [vmem:[%s3809_s1 + $0x478] sm:$0xff]  }
  0x77   :  { %3004 = vmatpush3.msra.mxu1 %v2259_v39  ;;  %2970 = vmatprep.subr.mxu0 %v2224_v40  ;;  %v2715_v38 = vld [vmem:[%s3809_s1 + $0x4f8] sm:$0xff]   ;;  %v2239_v39 = vunpack.c.l.bf16 %v2668_v24  ;;  %v2363_v49 = vunpack.c.l.bf16 %v2699_v35 }
  0x78   :  { %3005 = vmatprep.subr.mxu1 %v2288_v41  ;;  %2971 = vmatpush3.msra.mxu0 %v2192_v42  ;;  %v2691_v40 = vld [vmem:[%s3809_s1 + $0x438] sm:$0xff]   ;;  %v870_v42 = vcombine.high %v868_v32, %v868_v32  ;;  %v2428_v44 = vunpack.c.h.bf16 %v2715_v38 }
  0x79   :  { %3006 = vmatpush3.msra.mxu1 %v2256_v43  ;;  %2972 = vmatprep.subr.mxu0 %v2223_v46  ;;  %v2707_v41 = vld [vmem:[%s3809_s1 + $0x4b8] sm:$0xff]   ;;  %v2364_v43 = vunpack.c.h.bf16 %v2699_v35  ;;  %v2332_v45 = vunpack.c.h.bf16 %v2691_v40 }
  0x7a   :  { %3007 = vmatprep.subr.mxu1 %v2287_v47  ;;  %2973 = vmatpush3.msra.mxu0 %v2191_v50  ;;  %v2396_v46 = vunpack.c.h.bf16 %v2707_v41  ;;  %v2698_v47 = vld [vmem:[%s3809_s1 + $0x470] sm:$0xff]   ;;  %v2427_v50 = vunpack.c.l.bf16 %v2715_v38  ;;  %v2687_v24 = vld [vmem:[%s3809_s1 + $0x418] sm:$0xff]  }
  0x7b   :  { %3008 = vmatpush3.msra.mxu1 %v2255_v51  ;;  %2974 = vmatprep.subr.mxu0 %v2220_v52  ;;  %v2690_v51 = vld [vmem:[%s3809_s1 + $0x430] sm:$0xff]   ;;  %v2359_v60 = vunpack.c.l.bf16 %v2698_v47 }
  0x7c   :  { %3009 = vmatprep.subr.mxu1 %v2284_v53  ;;  %2975 = vmatpush3.msra.mxu0 %v2188_v54  ;;  %v2706_v52 = vld [vmem:[%s3809_s1 + $0x4b0] sm:$0xff]   ;;  %v2331_v53 = vunpack.c.l.bf16 %v2691_v40  ;;  %v2395_v54 = vunpack.c.l.bf16 %v2707_v41  ;;  %v2328_v56 = vunpack.c.h.bf16 %v2690_v51 }
  0x7d   :  { %3010 = vmatpush3.msra.mxu1 %v2252_v55  ;;  %2976 = vmatprep.subr.mxu0 %v2219_v57  ;;  %v2360_v55 = vunpack.c.h.bf16 %v2698_v47  ;;  %v2392_v57 = vunpack.c.h.bf16 %v2706_v52  ;;  %v3675_v38 = vld [vmem:[%s3810_s0 + $0x10] sm:$0xff] }
  0x7e   :  { %3011 = vmatprep.subr.mxu1 %v2283_v58  ;;  %2977 = vmatpush3.msra.mxu0 %v2187_v62  ;;  %v2697_v58 = vld [vmem:[%s3809_s1 + $0x468] sm:$0xff]   ;;  %v2423_v62 = vunpack.c.l.bf16 %v2714_v48  ;;  %v27_v47 = vunpack.c.l.bf16 %v3675_v38 }
  0x7f   :  { %3012 = vmatpush3.msra.mxu1 %v2251_v63  ;;  %2978 = vmatprep.subr.mxu0 %v2216_v0  ;;  %v2689_v63 = vld [vmem:[%s3809_s1 + $0x428] sm:$0xff]   ;;  %v2355_v9 = vunpack.c.l.bf16 %v2697_v58 }
  0x80   :  { %3013 = vmatprep.subr.mxu1 %v2280_v1  ;;  %2979 = vmatpush3.msra.mxu0 %v2184_v2  ;;  %v2705_v0 = vld [vmem:[%s3809_s1 + $0x4a8] sm:$0xff]   ;;  %v2327_v1 = vunpack.c.l.bf16 %v2690_v51  ;;  %v2391_v2 = vunpack.c.l.bf16 %v2706_v52  ;;  %v2324_v5 = vunpack.c.h.bf16 %v2689_v63  ;;  %v871_v59 = vcombine.high %v27_v47, %v27_v47 }
  0x81   :  { %3014 = vmatpush3.msra.mxu1 %v2248_v3  ;;  %2980 = vmatprep.subr.mxu0 %v2215_v7  ;;  %v2356_v3 = vunpack.c.h.bf16 %v2697_v58  ;;  %v2388_v6 = vunpack.c.h.bf16 %v2705_v0  ;;  %v2696_v7 = vld [vmem:[%s3809_s1 + $0x460] sm:$0xff]   ;;  %v2701_v51 = vld [vmem:[%s3809_s1 + $0x488] sm:$0xff]  }
  0x82   :  { %3015 = vmatprep.subr.mxu1 %v2279_v8  ;;  %2981 = vmatpush3.msra.mxu0 %v2183_v11  ;;  %v2712_v8 = vld [vmem:[%s3809_s1 + $0x4e0] sm:$0xff]  }
  0x83   :  { %3016 = vmatpush3.msra.mxu1 %v2247_v12  ;;  %2982 = vmatprep.subr.mxu0 %v2212_v13  ;;  %v2688_v11 = vld [vmem:[%s3809_s1 + $0x420] sm:$0xff]   ;;  %v2323_v13 = vunpack.c.l.bf16 %v2689_v63  ;;  %v2415_v23 = vunpack.c.l.bf16 %v2712_v8 }
  0x84   :  { %3017 = vmatprep.subr.mxu1 %v2276_v21  ;;  %2983 = vmatpush3.msra.mxu0 %v2180_v14  ;;  %v2704_v12 = vld [vmem:[%s3809_s1 + $0x4a0] sm:$0xff]   ;;  %v2387_v21 = vunpack.c.l.bf16 %v2705_v0  ;;  %v2352_v14 = vunpack.c.h.bf16 %v2696_v7  ;;  %v2320_v16 = vunpack.c.h.bf16 %v2688_v11 }
  0x85   :  { %3018 = vmatpush3.msra.mxu1 %v2244_v15  ;;  %2984 = vmatprep.subr.mxu0 %v2211_v20  ;;  %v2416_v15 = vunpack.c.h.bf16 %v2712_v8  ;;  %v2384_v17 = vunpack.c.h.bf16 %v2704_v12  ;;  %v2711_v20 = vld [vmem:[%s3809_s1 + $0x4d8] sm:$0xff]   ;;  %v2708_v58 = vld [vmem:[%s3809_s1 + $0x4c0] sm:$0xff]   ;;  %v885_v8 = vrot.slane %v871_v59, %v3282_v19 }
  0x86   :  { %3019 = vmatprep.subr.mxu1 %v2275_v22  ;;  %2985 = vmatpush3.msra.mxu0 %v2179_v25  ;;  %v2351_v22 = vunpack.c.l.bf16 %v2696_v7  ;;  %v2703_v25 = vld [vmem:[%s3809_s1 + $0x498] sm:$0xff]   ;;  %v2411_v35 = vunpack.c.l.bf16 %v2711_v20  ;;  %v2684_v63 = vld [vmem:[%s3809_s1 + $0x400] sm:$0xff]  }
  0x87   :  { %3020 = vmatpush3.msra.mxu1 %v2243_v26  ;;  %2986 = vmatprep.subr.mxu0 %v2208_v28  ;;  %v2319_v26 = vunpack.c.l.bf16 %v2688_v11  ;;  %v2348_v28 = vunpack.c.h.bf16 %v2695_v18  ;;  %v2379_v40 = vunpack.c.l.bf16 %v2703_v25  ;;  %v2700_v0 = vld [vmem:[%s3809_s1 + $0x480] sm:$0xff]   ;;  %v2731_v11 = vld [vmem:[%s3809_s1 + $0x578] sm:$0xff]  }
  0x88   :  { %3021 = vmatprep.subr.mxu1 %v2272_v29  ;;  %2987 = vmatpush3.msra.mxu0 %v2176_v30  ;;  %v2412_v29 = vunpack.c.h.bf16 %v2711_v20  ;;  %v2316_v30 = vunpack.c.h.bf16 %v2687_v24  ;;  %v2368_v7 = vunpack.c.h.bf16 %v2700_v0 }
  0x89   :  { %3022 = vmatpush3.msra.mxu1 %v2240_v31  ;;  %2988 = vmatprep.subr.mxu0 %v2207_v33  ;;  %v2380_v31 = vunpack.c.h.bf16 %v2703_v25  ;;  %v2710_v33 = vld [vmem:[%s3809_s1 + $0x4d0] sm:$0xff]  }
  0x8a   :  { %3023 = vmatprep.subr.mxu1 %v2271_v34  ;;  %2989 = vmatpush3.msra.mxu0 %v2175_v36  ;;  %v2347_v34 = vunpack.c.l.bf16 %v2695_v18  ;;  %v2686_v36 = vld [vmem:[%s3809_s1 + $0x410] sm:$0xff]   ;;  %v2492_v18 = vunpack.c.h.bf16 %v2731_v11 }
  0x8b   :  { %1413 = vmatprep.mubr.f32.mxu0 %v869_v37  ;;  %3024 = vmatpush3.msra.mxu1 %v2239_v39  ;;  %v2702_v37 = vld [vmem:[%s3809_s1 + $0x490] sm:$0xff]   ;;  %v2315_v39 = vunpack.c.l.bf16 %v2687_v24  ;;  %v2311_v52 = vunpack.c.l.bf16 %v2686_v36 }
  0x8c   :  { %1414 = vmatmul.mubr.f32.vlgmr.msra.gmra.mxu0 %v861_v27  ;;  %1483 = vmatprep.mubr.f32.mxu1 %v870_v42  ;;  %v2383_v27 = vunpack.c.l.bf16 %v2704_v12  ;;  %v2408_v42 = vunpack.c.h.bf16 %v2710_v33  ;;  %v2303_v12 = vunpack.c.l.bf16 %v2684_v63  ;;  %v2730_v24 = vld [vmem:[%s3809_s1 + $0x570] sm:$0xff]  }
  0x8d   :  { %3028 = vmatprep.subr.mxu0 %v2364_v43  ;;  %3063 = vmatprep.subr.mxu1 %v2428_v44  ;;  %v2312_v43 = vunpack.c.h.bf16 %v2686_v36  ;;  %v2376_v44 = vunpack.c.h.bf16 %v2702_v37  ;;  %v2746_v25 = vld [vmem:[%s3809_s1 + $0x5f0] sm:$0xff]   ;;  %v2729_v36 = vld [vmem:[%s3809_s1 + $0x568] sm:$0xff]  }
  0x8e   :  { %1484 = vmatmul.mubr.f32.vlgmr.msra.gmra.mxu1 %v868_v32  ;;  %3029 = vmatpush3.msra.mxu0 %v2332_v45  ;;  %v2694_v32 = vld [vmem:[%s3809_s1 + $0x450] sm:$0xff]   ;;  %v2693_v45 = vld [vmem:[%s3809_s1 + $0x448] sm:$0xff]  }
  0x8f   :  { %3064 = vmatpush3.msra.mxu1 %v2396_v46  ;;  %3030 = vmatprep.subr.mxu0 %v2363_v49  ;;  %v2344_v41 = vunpack.c.h.bf16 %v2694_v32  ;;  %v2709_v46 = vld [vmem:[%s3809_s1 + $0x4c8] sm:$0xff]   ;;  %v2343_v48 = vunpack.c.l.bf16 %v2694_v32  ;;  %v2407_v49 = vunpack.c.l.bf16 %v2710_v33  ;;  %v2488_v32 = vunpack.c.h.bf16 %v2730_v24 }
  0x90   :  { %3065 = vmatprep.subr.mxu1 %v2427_v50  ;;  %3031 = vmatpush3.msra.mxu0 %v2331_v53  ;;  %v2685_v50 = vld [vmem:[%s3809_s1 + $0x408] sm:$0xff]   ;;  %v2375_v53 = vunpack.c.l.bf16 %v2702_v37  ;;  %v2552_v33 = vunpack.c.h.bf16 %v2746_v25 }
  0x91   :  { %3066 = vmatpush3.msra.mxu1 %v2395_v54  ;;  %3032 = vmatprep.subr.mxu0 %v2360_v55  ;;  %v2340_v54 = vunpack.c.h.bf16 %v2693_v45  ;;  %v2404_v55 = vunpack.c.h.bf16 %v2709_v46  ;;  %v2745_v37 = vld [vmem:[%s3809_s1 + $0x5e8] sm:$0xff]  }
  0x92   :  { %3067 = vmatprep.subr.mxu1 %v2424_v61  ;;  %3033 = vmatpush3.msra.mxu0 %v2328_v56  ;;  %v2308_v61 = vunpack.c.h.bf16 %v2685_v50  ;;  %v2372_v56 = vunpack.c.h.bf16 %v2701_v51 }
  0x93   :  { %3068 = vmatpush3.msra.mxu1 %v2392_v57  ;;  %3034 = vmatprep.subr.mxu0 %v2359_v60  ;;  %v2692_v57 = vld [vmem:[%s3809_s1 + $0x440] sm:$0xff]   ;;  %v2339_v60 = vunpack.c.l.bf16 %v2693_v45  ;;  %v2484_v45 = vunpack.c.h.bf16 %v2729_v36 }
  0x94   :  { %3069 = vmatprep.subr.mxu1 %v2423_v62  ;;  %3035 = vmatpush3.msra.mxu0 %v2327_v1  ;;  %v2403_v62 = vunpack.c.l.bf16 %v2709_v46  ;;  %v2307_v1 = vunpack.c.l.bf16 %v2685_v50  ;;  %v2548_v46 = vunpack.c.h.bf16 %v2745_v37  ;;  %v2744_v50 = vld [vmem:[%s3809_s1 + $0x5e0] sm:$0xff]  }
  0x95   :  { %3070 = vmatpush3.msra.mxu1 %v2391_v2  ;;  %3036 = vmatprep.subr.mxu0 %v2356_v3  ;;  %v2371_v2 = vunpack.c.l.bf16 %v2701_v51  ;;  %v878_v3 = vrot.slane %v27_v47, %v3282_v19  ;;  %v2483_v51 = vunpack.c.l.bf16 %v2729_v36  ;;  %v2740_v36 = vld [vmem:[%s3809_s1 + $0x5c0] sm:$0xff]  }
  0x96   :  { %3071 = vmatprep.subr.mxu1 %v2420_v4  ;;  %3037 = vmatpush3.msra.mxu0 %v2324_v5  ;;  %v2336_v4 = vunpack.c.h.bf16 %v2692_v57  ;;  %v2400_v5 = vunpack.c.h.bf16 %v2708_v58 }
  0x97   :  { %3072 = vmatpush3.msra.mxu1 %v2388_v6  ;;  %3038 = vmatprep.subr.mxu0 %v2355_v9  ;;  %v2304_v6 = vunpack.c.h.bf16 %v2684_v63  ;;  %v2335_v9 = vunpack.c.l.bf16 %v2692_v57  ;;  %v2544_v57 = vunpack.c.h.bf16 %v2744_v50 }
  0x98   :  { %3073 = vmatprep.subr.mxu1 %v2419_v10  ;;  %3039 = vmatpush3.msra.mxu0 %v2323_v13  ;;  %v2399_v10 = vunpack.c.l.bf16 %v2708_v58  ;;  %v886_v13 = vcombine.high %v878_v3, %v878_v3 }
  0x99   :  { %3074 = vmatpush3.msra.mxu1 %v2387_v21  ;;  %3040 = vmatprep.subr.mxu0 %v2352_v14  ;;  %v2747_v21 = vld [vmem:[%s3809_s1 + $0x5f8] sm:$0xff]   ;;  %v2367_v14 = vunpack.c.l.bf16 %v2700_v0  ;;  %v2543_v0 = vunpack.c.l.bf16 %v2744_v50 }
  0x9a   :  { %3075 = vmatprep.subr.mxu1 %v2416_v15  ;;  %3041 = vmatpush3.msra.mxu0 %v2320_v16  ;;  %v2723_v15 = vld [vmem:[%s3809_s1 + $0x538] sm:$0xff]   ;;  %v2556_v20 = vunpack.c.h.bf16 %v2747_v21 }
  0x9b   :  { %3076 = vmatpush3.msra.mxu1 %v2384_v17  ;;  %3042 = vmatprep.subr.mxu0 %v2351_v22  ;;  %v2739_v16 = vld [vmem:[%s3809_s1 + $0x5b8] sm:$0xff]   ;;  %v887_v17 = vcombine.high %v885_v8, %v885_v8  ;;  %v2460_v22 = vunpack.c.h.bf16 %v2723_v15 }
  0x9c   :  { %3077 = vmatprep.subr.mxu1 %v2415_v23  ;;  %3043 = vmatpush3.msra.mxu0 %v2319_v26  ;;  %v2524_v23 = vunpack.c.h.bf16 %v2739_v16  ;;  %v2491_v26 = vunpack.c.l.bf16 %v2731_v11 }
  0x9d   :  { %3078 = vmatpush3.msra.mxu1 %v2383_v27  ;;  %3044 = vmatprep.subr.mxu0 %v2348_v28  ;;  %v2555_v27 = vunpack.c.l.bf16 %v2747_v21  ;;  %v2722_v28 = vld [vmem:[%s3809_s1 + $0x530] sm:$0xff]  }
  0x9e   :  { %3079 = vmatprep.subr.mxu1 %v2412_v29  ;;  %3045 = vmatpush3.msra.mxu0 %v2316_v30  ;;  %v2738_v29 = vld [vmem:[%s3809_s1 + $0x5b0] sm:$0xff]   ;;  %v2459_v30 = vunpack.c.l.bf16 %v2723_v15 }
  0x9f   :  { %3080 = vmatpush3.msra.mxu1 %v2380_v31  ;;  %3046 = vmatprep.subr.mxu0 %v2347_v34  ;;  %v2523_v31 = vunpack.c.l.bf16 %v2739_v16  ;;  %v2456_v34 = vunpack.c.h.bf16 %v2722_v28  ;;  %v2734_v21 = vld [vmem:[%s3809_s1 + $0x590] sm:$0xff]  }
  0xa0   :  { %3081 = vmatprep.subr.mxu1 %v2411_v35  ;;  %3047 = vmatpush3.msra.mxu0 %v2315_v39  ;;  %v2520_v35 = vunpack.c.h.bf16 %v2738_v29  ;;  %v2487_v39 = vunpack.c.l.bf16 %v2730_v24  ;;  %v2741_v24 = vld [vmem:[%s3809_s1 + $0x5c8] sm:$0xff]  }
  0xa1   :  { %3082 = vmatpush3.msra.mxu1 %v2379_v40  ;;  %3048 = vmatprep.subr.mxu0 %v2344_v41  ;;  %v2551_v40 = vunpack.c.l.bf16 %v2746_v25  ;;  %v2721_v41 = vld [vmem:[%s3809_s1 + $0x528] sm:$0xff]  }
  0xa2   :  { %3083 = vmatprep.subr.mxu1 %v2408_v42  ;;  %3049 = vmatpush3.msra.mxu0 %v2312_v43  ;;  %v2737_v42 = vld [vmem:[%s3809_s1 + $0x5a8] sm:$0xff]   ;;  %v2455_v43 = vunpack.c.l.bf16 %v2722_v28  ;;  %v2452_v47 = vunpack.c.h.bf16 %v2721_v41 }
  0xa3   :  { %3084 = vmatpush3.msra.mxu1 %v2376_v44  ;;  %3050 = vmatprep.subr.mxu0 %v2343_v48  ;;  %v2519_v44 = vunpack.c.l.bf16 %v2738_v29  ;;  %v2516_v48 = vunpack.c.h.bf16 %v2737_v42  ;;  %v2503_v29 = vunpack.c.l.bf16 %v2734_v21 }
  0xa4   :  { %3085 = vmatprep.subr.mxu1 %v2407_v49  ;;  %3051 = vmatpush3.msra.mxu0 %v2311_v52  ;;  %v2728_v49 = vld [vmem:[%s3809_s1 + $0x560] sm:$0xff]   ;;  %v2547_v52 = vunpack.c.l.bf16 %v2745_v37 }
  0xa5   :  { %3086 = vmatpush3.msra.mxu1 %v2375_v53  ;;  %3052 = vmatprep.subr.mxu0 %v2340_v54  ;;  %v2720_v53 = vld [vmem:[%s3809_s1 + $0x520] sm:$0xff]   ;;  %v2479_v63 = vunpack.c.l.bf16 %v2728_v49 }
  0xa6   :  { %3087 = vmatprep.subr.mxu1 %v2404_v55  ;;  %3053 = vmatpush3.msra.mxu0 %v2308_v61  ;;  %v2736_v54 = vld [vmem:[%s3809_s1 + $0x5a0] sm:$0xff]   ;;  %v2451_v55 = vunpack.c.l.bf16 %v2721_v41  ;;  %v2515_v61 = vunpack.c.l.bf16 %v2737_v42  ;;  %v2448_v58 = vunpack.c.h.bf16 %v2720_v53 }
  0xa7   :  { %3088 = vmatpush3.msra.mxu1 %v2372_v56  ;;  %3054 = vmatprep.subr.mxu0 %v2339_v60  ;;  %v2480_v56 = vunpack.c.h.bf16 %v2728_v49  ;;  %v2512_v59 = vunpack.c.h.bf16 %v2736_v54  ;;  %v2727_v60 = vld [vmem:[%s3809_s1 + $0x558] sm:$0xff]   ;;  %v2732_v41 = vld [vmem:[%s3809_s1 + $0x580] sm:$0xff]  }
  0xa8   :  { %3089 = vmatprep.subr.mxu1 %v2403_v62  ;;  %3055 = vmatpush3.msra.mxu0 %v2307_v1  ;;  %v2743_v62 = vld [vmem:[%s3809_s1 + $0x5d8] sm:$0xff]   ;;  %v2475_v11 = vunpack.c.l.bf16 %v2727_v60  ;;  %v2496_v49 = vunpack.c.h.bf16 %v2732_v41 }
  0xa9   :  { %3090 = vmatpush3.msra.mxu1 %v2371_v2  ;;  %3056 = vmatprep.subr.mxu0 %v2336_v4  ;;  %v2719_v1 = vld [vmem:[%s3809_s1 + $0x518] sm:$0xff]   ;;  %v2511_v4 = vunpack.c.l.bf16 %v2736_v54  ;;  %v2495_v54 = vunpack.c.l.bf16 %v2732_v41 }
  0xaa   :  { %3091 = vmatprep.subr.mxu1 %v2400_v5  ;;  %3057 = vmatpush3.msra.mxu0 %v2304_v6  ;;  %v2735_v2 = vld [vmem:[%s3809_s1 + $0x598] sm:$0xff]   ;;  %v2476_v5 = vunpack.c.h.bf16 %v2727_v60  ;;  %v2540_v6 = vunpack.c.h.bf16 %v2743_v62 }
  0xab   :  { %3092 = vmatpush3.msra.mxu1 %v2368_v7  ;;  %3058 = vmatprep.subr.mxu0 %v2335_v9  ;;  %v2444_v7 = vunpack.c.h.bf16 %v2719_v1  ;;  %v2726_v9 = vld [vmem:[%s3809_s1 + $0x550] sm:$0xff]   ;;  %v2507_v15 = vunpack.c.l.bf16 %v2735_v2 }
  0xac   :  { %3093 = vmatprep.subr.mxu1 %v2399_v10  ;;  %3059 = vmatpush3.msra.mxu0 %v2303_v12  ;;  %v2742_v10 = vld [vmem:[%s3809_s1 + $0x5d0] sm:$0xff]   ;;  %v2539_v12 = vunpack.c.l.bf16 %v2743_v62  ;;  %v2472_v16 = vunpack.c.h.bf16 %v2726_v9  ;;  %v2471_v25 = vunpack.c.l.bf16 %v2726_v9 }
  0xad   :  { %1553 = vmatprep.mubr.f32.mxu0 %v886_v13  ;;  %3094 = vmatpush3.msra.mxu1 %v2367_v14  ;;  %v2718_v13 = vld [vmem:[%s3809_s1 + $0x510] sm:$0xff]   ;;  %v2443_v14 = vunpack.c.l.bf16 %v2719_v1 }
  0xae   :  { %1554 = vmatmul.mubr.f32.vlgmr.msra.gmra.mxu0 %v878_v3  ;;  %1623 = vmatprep.mubr.f32.mxu1 %v887_v17  ;;  %v2447_v3 = vunpack.c.l.bf16 %v2720_v53  ;;  %v2536_v17 = vunpack.c.h.bf16 %v2742_v10  ;;  %v2439_v28 = vunpack.c.l.bf16 %v2718_v13 }
  0xaf   :  { %3098 = vmatprep.subr.mxu0 %v2492_v18  ;;  %3133 = vmatprep.subr.mxu1 %v2556_v20  ;;  %v28_v18 = vunpack.c.h.bf16 %v3675_v38  ;;  %v2440_v20 = vunpack.c.h.bf16 %v2718_v13  ;;  %v2717_v38 = vld [vmem:[%s3809_s1 + $0x508] sm:$0xff]  }
  0xb0   :  { %1624 = vmatmul.mubr.f32.vlgmr.msra.gmra.mxu1 %v885_v8  ;;  %3099 = vmatpush3.msra.mxu0 %v2460_v22  ;;  %v2508_v8 = vunpack.c.h.bf16 %v2735_v2  ;;  %v2504_v22 = vunpack.c.h.bf16 %v2734_v21  ;;  %v2435_v42 = vunpack.c.l.bf16 %v2717_v38 }
  0xb1   :  { %3134 = vmatpush3.msra.mxu1 %v2524_v23  ;;  %3100 = vmatprep.subr.mxu0 %v2491_v26  ;;  %v2725_v23 = vld [vmem:[%s3809_s1 + $0x548] sm:$0xff]   ;;  %v2535_v26 = vunpack.c.l.bf16 %v2742_v10 }
  0xb2   :  { %3135 = vmatprep.subr.mxu1 %v2555_v27  ;;  %3101 = vmatpush3.msra.mxu0 %v2459_v30  ;;  %v2733_v27 = vld [vmem:[%s3809_s1 + $0x588] sm:$0xff]   ;;  %v2468_v30 = vunpack.c.h.bf16 %v2725_v23  ;;  %v2467_v37 = vunpack.c.l.bf16 %v2725_v23 }
  0xb3   :  { %3136 = vmatpush3.msra.mxu1 %v2523_v31  ;;  %3102 = vmatprep.subr.mxu0 %v2488_v32  ;;  %v2532_v31 = vunpack.c.h.bf16 %v2741_v24  ;;  %v888_v32 = vcombine.high %v28_v18, %v28_v18 }
  0xb4   :  { %3137 = vmatprep.subr.mxu1 %v2552_v33  ;;  %3103 = vmatpush3.msra.mxu0 %v2456_v34  ;;  %v2436_v33 = vunpack.c.h.bf16 %v2717_v38  ;;  %v2500_v34 = vunpack.c.h.bf16 %v2733_v27 }
  0xb5   :  { %3138 = vmatpush3.msra.mxu1 %v2520_v35  ;;  %3104 = vmatprep.subr.mxu0 %v2487_v39  ;;  %v2724_v35 = vld [vmem:[%s3809_s1 + $0x540] sm:$0xff]   ;;  %v2531_v39 = vunpack.c.l.bf16 %v2741_v24 }
  0xb6   :  { %3139 = vmatprep.subr.mxu1 %v2551_v40  ;;  %3105 = vmatpush3.msra.mxu0 %v2455_v43  ;;  %v2716_v40 = vld [vmem:[%s3809_s1 + $0x500] sm:$0xff]   ;;  %v2499_v43 = vunpack.c.l.bf16 %v2733_v27  ;;  %v2463_v50 = vunpack.c.l.bf16 %v2724_v35 }
  0xb7   :  { %3140 = vmatpush3.msra.mxu1 %v2519_v44  ;;  %3106 = vmatprep.subr.mxu0 %v2484_v45  ;;  %v895_v44 = vrot.slane %v28_v18, %v3282_v19  ;;  %v2464_v45 = vunpack.c.h.bf16 %v2724_v35 }
  0xb8   :  { %3141 = vmatprep.subr.mxu1 %v2548_v46  ;;  %3107 = vmatpush3.msra.mxu0 %v2452_v47  ;;  %v2528_v46 = vunpack.c.h.bf16 %v2740_v36  ;;  %v902_v47 = vrot.slane %v888_v32, %v3282_v19  ;;  %v3171_v19 = vmov 0.0  }
  0xb9   :  { %3142 = vmatpush3.msra.mxu1 %v2516_v48  ;;  %3108 = vmatprep.subr.mxu0 %v2483_v51  ;;  %v2432_v48 = vunpack.c.h.bf16 %v2716_v40  ;;  %v2527_v51 = vunpack.c.l.bf16 %v2740_v36  ;;  %v903_v53 = vcombine.high %v895_v44, %v895_v44  ;;  %18 = vst [vmem:[#allocation2] sm:$0x3] %v3171_v19 }
  0xba   :  { %3143 = vmatprep.subr.mxu1 %v2547_v52  ;;  %3109 = vmatpush3.msra.mxu0 %v2451_v55  ;;  %v2431_v52 = vunpack.c.l.bf16 %v2716_v40  ;;  %v904_v55 = vcombine.high %v902_v47, %v902_v47 }
  0xbb   :  { %3144 = vmatpush3.msra.mxu1 %v2515_v61  ;;  %3110 = vmatprep.subr.mxu0 %v2480_v56 }
  0xbc   :  { %3145 = vmatprep.subr.mxu1 %v2544_v57  ;;  %3111 = vmatpush3.msra.mxu0 %v2448_v58 }
  0xbd   :  { %3146 = vmatpush3.msra.mxu1 %v2512_v59  ;;  %3112 = vmatprep.subr.mxu0 %v2479_v63 }
  0xbe   :  { %3147 = vmatprep.subr.mxu1 %v2543_v0  ;;  %3113 = vmatpush3.msra.mxu0 %v2447_v3 }
  0xbf   :  { %3148 = vmatpush3.msra.mxu1 %v2511_v4  ;;  %3114 = vmatprep.subr.mxu0 %v2476_v5 }
  0xc0   :  { %3149 = vmatprep.subr.mxu1 %v2540_v6  ;;  %3115 = vmatpush3.msra.mxu0 %v2444_v7 }
  0xc1   :  { %3150 = vmatpush3.msra.mxu1 %v2508_v8  ;;  %3116 = vmatprep.subr.mxu0 %v2475_v11 }
  0xc2   :  { %3151 = vmatprep.subr.mxu1 %v2539_v12  ;;  %3117 = vmatpush3.msra.mxu0 %v2443_v14 }
  0xc3   :  { %3152 = vmatpush3.msra.mxu1 %v2507_v15  ;;  %3118 = vmatprep.subr.mxu0 %v2472_v16 }
  0xc4   :  { %3153 = vmatprep.subr.mxu1 %v2536_v17  ;;  %3119 = vmatpush3.msra.mxu0 %v2440_v20 }
  0xc5   :  { %3154 = vmatpush3.msra.mxu1 %v2504_v22  ;;  %3120 = vmatprep.subr.mxu0 %v2471_v25 }
  0xc6   :  { %3155 = vmatprep.subr.mxu1 %v2535_v26  ;;  %3121 = vmatpush3.msra.mxu0 %v2439_v28 }
  0xc7   :  { %3156 = vmatpush3.msra.mxu1 %v2503_v29  ;;  %3122 = vmatprep.subr.mxu0 %v2468_v30 }
  0xc8   :  { %3157 = vmatprep.subr.mxu1 %v2532_v31  ;;  %3123 = vmatpush3.msra.mxu0 %v2436_v33 }
  0xc9   :  { %3158 = vmatpush3.msra.mxu1 %v2500_v34  ;;  %3124 = vmatprep.subr.mxu0 %v2467_v37 }
  0xca   :  { %3159 = vmatprep.subr.mxu1 %v2531_v39  ;;  %3125 = vmatpush3.msra.mxu0 %v2435_v42  ;;  %v19_v39 = vld [vmem:[#allocation2] sm:$0x3] }
  0xcb   :  { %3160 = vmatpush3.msra.mxu1 %v2499_v43  ;;  %3126 = vmatprep.subr.mxu0 %v2464_v45  ;;  %v1788_v42 = vld [vmem:[%s3811_s2] ss:$0 sm:$0xff] }
  0xcc   :  { %3161 = vmatprep.subr.mxu1 %v2528_v46  ;;  %3127 = vmatpush3.msra.mxu0 %v2432_v48 }
  0xcd   :  { %3162 = vmatpush3.msra.mxu1 %v2496_v49  ;;  %3128 = vmatprep.subr.mxu0 %v2463_v50 }
  0xce   :  { %3163 = vmatprep.subr.mxu1 %v2527_v51  ;;  %3129 = vmatpush3.msra.mxu0 %v2431_v52 }
  0xcf   :  { %1693 = vmatprep.mubr.f32.mxu0 %v903_v53  ;;  %3164 = vmatpush3.msra.mxu1 %v2495_v54 }
  0xd0   :  { %1763 = vmatprep.mubr.f32.mxu1 %v904_v55  ;;  %1694 = vmatmul.mubr.f32.vlgmr.msra.gmra.mxu0 %v895_v44 }
  0xd1   :  { %1764 = vmatmul.mubr.f32.vlgmr.msra.gmra.mxu1 %v902_v47 }
  0xe6   :  { %v2780_v61 = vpop.f32.mrf.mxu0 }
  0xe7   :  { %v2815_v56 = vpop.f32.mrf.mxu1 }
  0xe8   :  { %v2781_v57 = vpop.f32.mrf.mxu0 }
  0xe9   :  { %v2816_v59 = vpop.f32.mrf.mxu1  ;;  %v2782_v63 = vadd.f32 %v2781_v57, %v2780_v61 }
  0xea   :  { %v2817_v0 = vadd.f32 %v2816_v59, %v2815_v56 }
  0xec   :  { %v1066_v4 = vadd.f32 %v2817_v0, %v2782_v63 }
 0x108   :  { %v2850_v58 = vpop.f32.mrf.mxu0 }
 0x10a   :  { %v2885_v60 = vpop.f32.mrf.mxu1  ;;  %v2851_v62 = vpop.f32.mrf.mxu0 }
 0x10b   :  { %v2852_v2 = vadd.f32 %v2851_v62, %v2850_v58 }
 0x10c   :  { %v2886_v3 = vpop.f32.mrf.mxu1 }
 0x10d   :  { %v1136_v7 = vadd.f32 %v2852_v2, %v1066_v4  ;;  %v2887_v8 = vadd.f32 %v2886_v3, %v2885_v60 }
 0x10f   :  { %v1206_v12 = vadd.f32 %v2887_v8, %v1136_v7 }
 0x12a   :  { %v2920_v1 = vpop.f32.mrf.mxu0 }
 0x12c   :  { %v2955_v5 = vpop.f32.mrf.mxu1  ;;  %v2921_v6 = vpop.f32.mrf.mxu0 }
 0x12d   :  { %v2922_v10 = vadd.f32 %v2921_v6, %v2920_v1 }
 0x12e   :  { %v2956_v11 = vpop.f32.mrf.mxu1 }
 0x12f   :  { %v1276_v14 = vadd.f32 %v2922_v10, %v1206_v12  ;;  %v2957_v15 = vadd.f32 %v2956_v11, %v2955_v5 }
 0x131   :  { %v1346_v20 = vadd.f32 %v2957_v15, %v1276_v14 }
 0x14c   :  { %v2990_v9 = vpop.f32.mrf.mxu0 }
 0x14e   :  { %v3025_v13 = vpop.f32.mrf.mxu1  ;;  %v2991_v21 = vpop.f32.mrf.mxu0 }
 0x14f   :  { %v2992_v17 = vadd.f32 %v2991_v21, %v2990_v9 }
 0x150   :  { %v3026_v18 = vpop.f32.mrf.mxu1 }
 0x151   :  { %v1416_v24 = vadd.f32 %v2992_v17, %v1346_v20  ;;  %v3027_v25 = vadd.f32 %v3026_v18, %v3025_v13 }
 0x153   :  { %v1486_v27 = vadd.f32 %v3027_v25, %v1416_v24 }
 0x16e   :  { %v3060_v16 = vpop.f32.mrf.mxu0 }
 0x170   :  { %v3095_v22 = vpop.f32.mrf.mxu1  ;;  %v3061_v23 = vpop.f32.mrf.mxu0 }
 0x171   :  { %v3062_v26 = vadd.f32 %v3061_v23, %v3060_v16 }
 0x172   :  { %v3096_v38 = vpop.f32.mrf.mxu1 }
 0x173   :  { %v1556_v28 = vadd.f32 %v3062_v26, %v1486_v27  ;;  %v3097_v29 = vadd.f32 %v3096_v38, %v3095_v22 }
 0x175   :  { %v1626_v34 = vadd.f32 %v3097_v29, %v1556_v28 }
 0x190   :  { %v3130_v30 = vpop.f32.mrf.mxu0 }
 0x191   :  { %v3165_v31 = vpop.f32.mrf.mxu1 }
 0x192   :  { %v3131_v32 = vpop.f32.mrf.mxu0 }
 0x193   :  { %v3166_v33 = vpop.f32.mrf.mxu1  ;;  %v3132_v35 = vadd.f32 %v3131_v32, %v3130_v30 }
 0x194   :  { %v3167_v37 = vadd.f32 %v3166_v33, %v3165_v31 }
 0x195   :  { %v1696_v36 = vadd.f32 %v3132_v35, %v1626_v34 }
 0x197   :  { %v1766_v40 = vadd.f32 %v3167_v37, %v1696_v36 }
 0x199   :  { %v1769_v41 = vadd.f32 %v1766_v40, %v19_v39 }
 0x19b   :  { %1770 = vst [vmem:[#allocation2] sm:$0x3] %v1769_v41 }
 0x1a2   :  { %v1774_v43 = vld [vmem:[#allocation2] sm:$0x3] }
 0x1a3   :  { %v1782_v44 = vadd.f32 %v1788_v42, %v1774_v43 }
 0x1a5   :  { %1783 = vst [vmem:[%s3812_s3] sm:$0x3] %v1782_v44 }

</bundles_post_ra>
